<compile_context>
chip_gen: v6e
topology: v6e:2x2x1
jax: 0.10.0
libtpu: 0.0.40
codegen_flags: <defaults>
</compile_context>

<pallas_src>
import functools

import jax
import jax.numpy as jnp
import numpy as np
from jax.experimental import pallas as pl
from jax.experimental.pallas import tpu as pltpu


def _embedding_kernel(*refs, tile_s, seq_len, n_slots, pos_mode,
                      apply_layer_norm, eps):
    """pos_mode: 'none' (use_rope), 'slice' (default arange positions), 'gather'."""
    it = iter(refs)
    tok_ids = next(it)                                    # SMEM  [B*S] int32
    pos_ids = next(it) if pos_mode == "gather" else None  # SMEM  [B*S] int32
    tok_hbm = next(it)                                    # HBM   [V, D]
    pos_src = next(it) if pos_mode != "none" else None    # VMEM (tile_s,D) | HBM [P,D]
    gamma_ref = next(it)                                  # VMEM  (1, D)
    beta_ref = next(it)                                   # VMEM  (1, D)
    out_ref = next(it)                                    # VMEM  (tile_s, D)
    tok_buf = next(it)                                    # VMEM  (n_slots, tile_s, D)
    tok_sem = next(it)                                    # DMA sems (n_slots,)
    if pos_mode == "gather":
        pos_buf = next(it)                                # VMEM  (n_slots, tile_s, D)
        pos_sem = next(it)                                # DMA sems (n_slots,)

    b = pl.program_id(0)
    s = pl.program_id(1)
    num_s = pl.num_programs(1)
    base = b * seq_len + s * tile_s

    gathers = [(tok_ids, tok_hbm, tok_buf, tok_sem)]
    if pos_mode == "gather":
        gathers.append((pos_ids, pos_src, pos_buf, pos_sem))

    def issue(slot_idx, row_base):
        # One row DMA per token; all copies of a tile share one semaphore.
        # Scalar ids are read from SMEM before any .wait() is reached.
        for ids, src, buf, sem in gathers:
            n_src = src.shape[0]
            for i in range(tile_s):
                idx = ids[row_base + i]
                idx = jnp.maximum(jnp.minimum(idx, n_src - 1), 0)   # OOB-id guard
                pltpu.make_async_copy(src.at[pl.ds(idx, 1), :],
                                      buf.at[slot_idx, pl.ds(i, 1), :],
                                      sem.at[slot_idx]).start()

    def wait(slot_idx):
        # Aggregate wait: every row copy has identical byte count, so waiting
        # tile_s row-sized descriptors on the shared semaphore consumes exactly
        # the completions produced by issue().  Source index is a dummy.
        for ids, src, buf, sem in gathers:
            for i in range(tile_s):
                pltpu.make_async_copy(src.at[pl.ds(0, 1), :],
                                      buf.at[slot_idx, pl.ds(i, 1), :],
                                      sem.at[slot_idx]).wait()

    if n_slots == 1:
        # Single sequence tile per batch row: no cross-tile prefetch possible.
        slot = 0
        issue(0, base)
    else:
        slot = s % 2

        @pl.when(s == 0)
        def _():                       # first tile of this batch row: not prefetched
            issue(0, base)

        @pl.when(s + 1 < num_s)
        def _():                       # prefetch next tile of the SAME batch row
            issue(1 - slot, base + tile_s)

    wait(slot)
    emb = tok_buf[slot].astype(jnp.float32)               # (tile_s, D)

    if pos_mode == "slice":
        # Default arange(S) positions: contiguous slice delivered by the
        # BlockSpec pipeline -> plain VPU add.
        emb = emb + pos_src[...].astype(jnp.float32)
    elif pos_mode == "gather":
        emb = emb + pos_buf[slot].astype(jnp.float32)

    if apply_layer_norm:
        # nn.LayerNorm(normalized_shape=D, eps=1e-8): biased variance over D.
        mean = jnp.mean(emb, axis=-1, keepdims=True)
        centered = emb - mean
        var = jnp.mean(centered * centered, axis=-1, keepdims=True)
        emb = centered * jax.lax.rsqrt(var + eps)
        emb = emb * gamma_ref[...] + beta_ref[...]
        # TODO(synk): nn.Dropout(p=0.1) after the norm is identity in eval mode;
        # training-mode dropout is not implemented here.
        # TODO(synk): layer_norm_type='rms*' (RMSNorm) is not implemented — the
        # RMSNorm class is not defined in the provided module source.

    out_ref[...] = emb.astype(out_ref.dtype)


def _pick_tile(seq_len, cap=128):
    """Largest sequence tile that divides seq_len and keeps (8,128) block rules."""
    if seq_len <= cap:
        return seq_len
    for t in range(cap, 7, -1):
        if seq_len % t == 0 and t % 8 == 0:
            return t
    return seq_len  # fall back: whole sequence per grid step


def embedding_forward(input_ids, token_table, position_table=None,
                      gamma=None, beta=None, position_ids=None, *,
                      use_rope=False, apply_layer_norm=True, eps=1e-8,
                      tile_s=None):
    """JAX/Pallas equivalent of Embedding.forward (eval mode)."""
    B, S = input_ids.shape
    V, D = token_table.shape

    tile = tile_s if tile_s is not None else _pick_tile(S)
    assert S % tile == 0, "sequence tile must divide the sequence length"
    num_s = S // tile
    n_slots = 2 if num_s > 1 else 1

    if use_rope:
        pos_mode = "none"
    else:
        assert position_table is not None
        P = position_table.shape[0]
        if position_ids is None and (tile % 8 == 0 or tile == P):
            pos_mode = "slice"      # default arange(S) positions -> sliced add
        else:
            pos_mode = "gather"     # explicit position_ids -> DMA gather

    tok_ids_flat = input_ids.astype(jnp.int32).reshape(B * S)

    if gamma is None:
        gamma = jnp.ones((D,), jnp.float32)
    if beta is None:
        beta = jnp.zeros((D,), jnp.float32)
    gamma2d = gamma.reshape(1, D).astype(jnp.float32)
    beta2d = beta.reshape(1, D).astype(jnp.float32)

    call_args = [tok_ids_flat]
    num_prefetch = 1
    if pos_mode == "gather":
        if position_ids is None:
            position_ids = jnp.broadcast_to(
                jnp.arange(S, dtype=jnp.int32)[None, :], (B, S))
        call_args.append(position_ids.astype(jnp.int32).reshape(B * S))
        num_prefetch = 2

    in_specs = [pl.BlockSpec(memory_space=pl.ANY)]            # token table (HBM)
    call_args.append(token_table)
    if pos_mode == "slice":
        in_specs.append(pl.BlockSpec((tile, D), lambda b, s, *_: (s, 0)))
        call_args.append(position_table)
    elif pos_mode == "gather":
        in_specs.append(pl.BlockSpec(memory_space=pl.ANY))    # position table (HBM)
        call_args.append(position_table)
    in_specs += [pl.BlockSpec((1, D), lambda b, s, *_: (0, 0)),
                 pl.BlockSpec((1, D), lambda b, s, *_: (0, 0))]
    call_args += [gamma2d, beta2d]

    scratch_shapes = [pltpu.VMEM((n_slots, tile, D), token_table.dtype),
                      pltpu.SemaphoreType.DMA((n_slots,))]
    if pos_mode == "gather":
        scratch_shapes += [pltpu.VMEM((n_slots, tile, D), position_table.dtype),
                           pltpu.SemaphoreType.DMA((n_slots,))]

    kernel = functools.partial(_embedding_kernel, tile_s=tile, seq_len=S,
                               n_slots=n_slots, pos_mode=pos_mode,
                               apply_layer_norm=apply_layer_norm, eps=eps)

    grid_spec = pltpu.PrefetchScalarGridSpec(
        num_scalar_prefetch=num_prefetch,
        grid=(B, num_s),
        in_specs=in_specs,
        out_specs=pl.BlockSpec((None, tile, D), lambda b, s, *_: (b, s, 0)),
        scratch_shapes=scratch_shapes)

    # Sequence axis must stay in-order when the cross-tile prefetch is active.
    seq_sem = "parallel" if n_slots == 1 else "arbitrary"
    out = pl.pallas_call(
        kernel,
        out_shape=jax.ShapeDtypeStruct((B, S, D), token_table.dtype),
        grid_spec=grid_spec,
        compiler_params=pltpu.CompilerParams(
            dimension_semantics=("parallel", seq_sem)),
    )(*call_args)
    return out


if __name__ == "__main__":
    B, S = 2, 16
    vocab_size, max_positions, embedding_dim = 64, 32, 128

    key = jax.random.PRNGKey(0)
    k_tok, k_pos, k_ids, k_pid = jax.random.split(key, 4)

    # nn.Embedding default init: N(0, 1); nn.LayerNorm default: weight=1, bias=0.
    token_table = jax.random.normal(k_tok, (vocab_size, embedding_dim), jnp.float32)
    position_table = jax.random.normal(k_pos, (max_positions, embedding_dim), jnp.float32)
    gamma = jnp.ones((embedding_dim,), jnp.float32)
    beta = jnp.zeros((embedding_dim,), jnp.float32)
    input_ids = jax.random.randint(k_ids, (B, S), 0, vocab_size, dtype=jnp.int32)

    def reference(ids, pos_ids, *, use_rope, apply_layer_norm):
        emb = token_table[ids]
        if not use_rope:
            if pos_ids is None:
                pos_ids = jnp.broadcast_to(
                    jnp.arange(S, dtype=jnp.int32)[None, :], ids.shape)
            emb = emb + position_table[pos_ids]
        if apply_layer_norm:
            mean = emb.mean(-1, keepdims=True)
            var = ((emb - mean) ** 2).mean(-1, keepdims=True)
            emb = (emb - mean) * jax.lax.rsqrt(var + 1e-8) * gamma + beta
        return emb

    # 1) Default learned positions (sliced-add path) + LayerNorm.
    #    tile_s=8 forces multiple sequence tiles -> exercises the cross-tile
    #    double-buffered prefetch path.
    out1 = embedding_forward(input_ids, token_table, position_table, gamma, beta,
                             use_rope=False, apply_layer_norm=True, eps=1e-8,
                             tile_s=8)
    out1 = jax.block_until_ready(out1)
    np.testing.assert_allclose(
        np.asarray(out1),
        np.asarray(reference(input_ids, None, use_rope=False, apply_layer_norm=True)),
        rtol=1e-5, atol=1e-5)

    # 2) Explicit position_ids (DMA-gather path, double-buffered) + LayerNorm.
    pos_ids = jax.random.randint(k_pid, (B, S), 0, max_positions, dtype=jnp.int32)
    out2 = embedding_forward(input_ids, token_table, position_table, gamma, beta,
                             position_ids=pos_ids, use_rope=False,
                             apply_layer_norm=True, eps=1e-8, tile_s=8)
    out2 = jax.block_until_ready(out2)
    np.testing.assert_allclose(
        np.asarray(out2),
        np.asarray(reference(input_ids, pos_ids, use_rope=False, apply_layer_norm=True)),
        rtol=1e-5, atol=1e-5)

    # 3) use_rope=True: token embedding only (RoPE itself is applied later, in
    #    attention, exactly as in the PyTorch module), no norm (module default).
    #    Uses the whole-sequence single-tile path (no prefetch).
    out3 = embedding_forward(input_ids, token_table, use_rope=True,
                             apply_layer_norm=False)
    out3 = jax.block_until_ready(out3)
    np.testing.assert_allclose(
        np.asarray(out3),
        np.asarray(reference(input_ids, None, use_rope=True, apply_layer_norm=False)),
        rtol=1e-6, atol=1e-6)

    assert out1.shape == (B, S, embedding_dim)
    print("KERNEL_OK")
</pallas_src>

<mosaic_0001>
module attributes {stable_mosaic.version = 11 : i64} {
  func.func @_embedding_kernel(%arg0: i32, %arg1: i32, %arg2: memref<32xi32, #tpu.memory_space<smem>>, %arg3: memref<64x128xf32, #tpu.memory_space<any>>, %arg4: memref<8x128xf32, #tpu.memory_space<vmem>>, %arg5: memref<1x128xf32, #tpu.memory_space<vmem>>, %arg6: memref<1x128xf32, #tpu.memory_space<vmem>>, %arg7: memref<1x8x128xf32, #tpu.memory_space<vmem>>, %arg8: memref<2x8x128xf32, #tpu.memory_space<vmem>>, %arg9: memref<2x!tpu.dma_semaphore, #tpu.memory_space<semaphore_mem>>) attributes {dimension_semantics = [#tpu.dimension_semantics<parallel>, #tpu.dimension_semantics<arbitrary>], iteration_bounds = array<i64: 2, 2>, scalar_prefetch = 1 : i64, scratch_operands = 2 : i64, tpu.core_type = #tpu.core_type<tc>, window_params = [{}, {transform_indices = @transform_1, window_bounds = array<i64: 8, 128>}, {pipeline_mode = #tpu.pipeline_mode<synchronous>, transform_indices = @transform_2, window_bounds = array<i64: 1, 128>}, {pipeline_mode = #tpu.pipeline_mode<synchronous>, transform_indices = @transform_3, window_bounds = array<i64: 1, 128>}, {transform_indices = @transform_4, window_bounds = array<i64: 1, 8, 128>}]} {
    %c16_i32 = arith.constant 16 : i32
    %0 = arith.muli %arg0, %c16_i32 : i32
    %c8_i32 = arith.constant 8 : i32
    %1 = arith.muli %arg1, %c8_i32 : i32
    %2 = arith.addi %0, %1 : i32
    %c2_i32 = arith.constant 2 : i32
    %c0_i32 = arith.constant 0 : i32
    %3 = arith.cmpi eq, %c2_i32, %c0_i32 : i32
    %c1_i32 = arith.constant 1 : i32
    %4 = arith.select %3, %c1_i32, %c2_i32 : i32
    %5 = arith.remsi %arg1, %4 : i32
    %c0_i32_0 = arith.constant 0 : i32
    %6 = arith.cmpi ne, %5, %c0_i32_0 : i32
    %c0_i32_1 = arith.constant 0 : i32
    %7 = arith.cmpi slt, %5, %c0_i32_1 : i32
    %c0_i32_2 = arith.constant 0 : i32
    %8 = arith.cmpi slt, %4, %c0_i32_2 : i32
    %9 = arith.xori %7, %8 : i1
    %10 = arith.andi %9, %6 : i1
    %11 = arith.addi %5, %4 : i32
    %12 = arith.select %10, %11, %5 : i32
    %c0_i32_3 = arith.constant 0 : i32
    %13 = arith.cmpi eq, %arg1, %c0_i32_3 : i32
    %14 = arith.extui %13 : i1 to i32
    %c0_i32_4 = arith.constant 0 : i32
    %15 = arith.cmpi ne, %14, %c0_i32_4 : i32
    scf.if %15 {
      %c0_i32_49 = arith.constant 0 : i32
      %90 = arith.addi %2, %c0_i32_49 : i32
      %91 = arith.index_cast %90 : i32 to index
      %92 = memref.load %arg2[%91] : memref<32xi32, #tpu.memory_space<smem>>
      %c63_i32 = arith.constant 63 : i32
      %93 = arith.minsi %92, %c63_i32 : i32
      %c0_i32_50 = arith.constant 0 : i32
      %94 = arith.maxsi %93, %c0_i32_50 : i32
      %c0_i32_51 = arith.constant 0 : i32
      %c0_i32_52 = arith.constant 0 : i32
      %c0_i32_53 = arith.constant 0 : i32
      %95 = tpu.memref_slice %arg3[%94, %c0_i32_53] : memref<64x128xf32, #tpu.memory_space<any>> -> memref<1x128xf32, #tpu.memory_space<any>>
      %c0_i32_54 = arith.constant 0 : i32
      %c0_i32_55 = arith.constant 0 : i32
      %96 = tpu.memref_slice %arg8[%c0_i32_51, %c0_i32_54, %c0_i32_55] : memref<2x8x128xf32, #tpu.memory_space<vmem>> -> memref<1x1x128xf32, #tpu.memory_space<vmem>>
      %97 = tpu.memref_squeeze %96 : memref<1x1x128xf32, #tpu.memory_space<vmem>> -> memref<1x128xf32, #tpu.memory_space<vmem>>
      %98 = tpu.memref_slice %arg9[%c0_i32_52] : memref<2x!tpu.dma_semaphore, #tpu.memory_space<semaphore_mem>> -> memref<1x!tpu.dma_semaphore, #tpu.memory_space<semaphore_mem>>
      %99 = tpu.memref_squeeze %98 : memref<1x!tpu.dma_semaphore, #tpu.memory_space<semaphore_mem>> -> memref<!tpu.dma_semaphore, #tpu.memory_space<semaphore_mem>>
      tpu.enqueue_dma source(%95 : memref<1x128xf32, #tpu.memory_space<any>>) target(%97 : memref<1x128xf32, #tpu.memory_space<vmem>>) target_semaphore(%99 : memref<!tpu.dma_semaphore, #tpu.memory_space<semaphore_mem>>)
      %c1_i32_56 = arith.constant 1 : i32
      %100 = arith.addi %2, %c1_i32_56 : i32
      %101 = arith.index_cast %100 : i32 to index
      %102 = memref.load %arg2[%101] : memref<32xi32, #tpu.memory_space<smem>>
      %c63_i32_57 = arith.constant 63 : i32
      %103 = arith.minsi %102, %c63_i32_57 : i32
      %c0_i32_58 = arith.constant 0 : i32
      %104 = arith.maxsi %103, %c0_i32_58 : i32
      %c0_i32_59 = arith.constant 0 : i32
      %c0_i32_60 = arith.constant 0 : i32
      %c0_i32_61 = arith.constant 0 : i32
      %105 = tpu.memref_slice %arg3[%104, %c0_i32_61] : memref<64x128xf32, #tpu.memory_space<any>> -> memref<1x128xf32, #tpu.memory_space<any>>
      %c1_i32_62 = arith.constant 1 : i32
      %c0_i32_63 = arith.constant 0 : i32
      %106 = tpu.memref_slice %arg8[%c0_i32_59, %c1_i32_62, %c0_i32_63] : memref<2x8x128xf32, #tpu.memory_space<vmem>> -> memref<1x1x128xf32, #tpu.memory_space<vmem>>
      %107 = tpu.memref_squeeze %106 : memref<1x1x128xf32, #tpu.memory_space<vmem>> -> memref<1x128xf32, #tpu.memory_space<vmem>>
      %108 = tpu.memref_slice %arg9[%c0_i32_60] : memref<2x!tpu.dma_semaphore, #tpu.memory_space<semaphore_mem>> -> memref<1x!tpu.dma_semaphore, #tpu.memory_space<semaphore_mem>>
      %109 = tpu.memref_squeeze %108 : memref<1x!tpu.dma_semaphore, #tpu.memory_space<semaphore_mem>> -> memref<!tpu.dma_semaphore, #tpu.memory_space<semaphore_mem>>
      tpu.enqueue_dma source(%105 : memref<1x128xf32, #tpu.memory_space<any>>) target(%107 : memref<1x128xf32, #tpu.memory_space<vmem>>) target_semaphore(%109 : memref<!tpu.dma_semaphore, #tpu.memory_space<semaphore_mem>>)
      %c2_i32_64 = arith.constant 2 : i32
      %110 = arith.addi %2, %c2_i32_64 : i32
      %111 = arith.index_cast %110 : i32 to index
      %112 = memref.load %arg2[%111] : memref<32xi32, #tpu.memory_space<smem>>
      %c63_i32_65 = arith.constant 63 : i32
      %113 = arith.minsi %112, %c63_i32_65 : i32
      %c0_i32_66 = arith.constant 0 : i32
      %114 = arith.maxsi %113, %c0_i32_66 : i32
      %c0_i32_67 = arith.constant 0 : i32
      %c0_i32_68 = arith.constant 0 : i32
      %c0_i32_69 = arith.constant 0 : i32
      %115 = tpu.memref_slice %arg3[%114, %c0_i32_69] : memref<64x128xf32, #tpu.memory_space<any>> -> memref<1x128xf32, #tpu.memory_space<any>>
      %c2_i32_70 = arith.constant 2 : i32
      %c0_i32_71 = arith.constant 0 : i32
      %116 = tpu.memref_slice %arg8[%c0_i32_67, %c2_i32_70, %c0_i32_71] : memref<2x8x128xf32, #tpu.memory_space<vmem>> -> memref<1x1x128xf32, #tpu.memory_space<vmem>>
      %117 = tpu.memref_squeeze %116 : memref<1x1x128xf32, #tpu.memory_space<vmem>> -> memref<1x128xf32, #tpu.memory_space<vmem>>
      %118 = tpu.memref_slice %arg9[%c0_i32_68] : memref<2x!tpu.dma_semaphore, #tpu.memory_space<semaphore_mem>> -> memref<1x!tpu.dma_semaphore, #tpu.memory_space<semaphore_mem>>
      %119 = tpu.memref_squeeze %118 : memref<1x!tpu.dma_semaphore, #tpu.memory_space<semaphore_mem>> -> memref<!tpu.dma_semaphore, #tpu.memory_space<semaphore_mem>>
      tpu.enqueue_dma source(%115 : memref<1x128xf32, #tpu.memory_space<any>>) target(%117 : memref<1x128xf32, #tpu.memory_space<vmem>>) target_semaphore(%119 : memref<!tpu.dma_semaphore, #tpu.memory_space<semaphore_mem>>)
      %c3_i32_72 = arith.constant 3 : i32
      %120 = arith.addi %2, %c3_i32_72 : i32
      %121 = arith.index_cast %120 : i32 to index
      %122 = memref.load %arg2[%121] : memref<32xi32, #tpu.memory_space<smem>>
      %c63_i32_73 = arith.constant 63 : i32
      %123 = arith.minsi %122, %c63_i32_73 : i32
      %c0_i32_74 = arith.constant 0 : i32
      %124 = arith.maxsi %123, %c0_i32_74 : i32
      %c0_i32_75 = arith.constant 0 : i32
      %c0_i32_76 = arith.constant 0 : i32
      %c0_i32_77 = arith.constant 0 : i32
      %125 = tpu.memref_slice %arg3[%124, %c0_i32_77] : memref<64x128xf32, #tpu.memory_space<any>> -> memref<1x128xf32, #tpu.memory_space<any>>
      %c3_i32_78 = arith.constant 3 : i32
      %c0_i32_79 = arith.constant 0 : i32
      %126 = tpu.memref_slice %arg8[%c0_i32_75, %c3_i32_78, %c0_i32_79] : memref<2x8x128xf32, #tpu.memory_space<vmem>> -> memref<1x1x128xf32, #tpu.memory_space<vmem>>
      %127 = tpu.memref_squeeze %126 : memref<1x1x128xf32, #tpu.memory_space<vmem>> -> memref<1x128xf32, #tpu.memory_space<vmem>>
      %128 = tpu.memref_slice %arg9[%c0_i32_76] : memref<2x!tpu.dma_semaphore, #tpu.memory_space<semaphore_mem>> -> memref<1x!tpu.dma_semaphore, #tpu.memory_space<semaphore_mem>>
      %129 = tpu.memref_squeeze %128 : memref<1x!tpu.dma_semaphore, #tpu.memory_space<semaphore_mem>> -> memref<!tpu.dma_semaphore, #tpu.memory_space<semaphore_mem>>
      tpu.enqueue_dma source(%125 : memref<1x128xf32, #tpu.memory_space<any>>) target(%127 : memref<1x128xf32, #tpu.memory_space<vmem>>) target_semaphore(%129 : memref<!tpu.dma_semaphore, #tpu.memory_space<semaphore_mem>>)
      %c4_i32_80 = arith.constant 4 : i32
      %130 = arith.addi %2, %c4_i32_80 : i32
      %131 = arith.index_cast %130 : i32 to index
      %132 = memref.load %arg2[%131] : memref<32xi32, #tpu.memory_space<smem>>
      %c63_i32_81 = arith.constant 63 : i32
      %133 = arith.minsi %132, %c63_i32_81 : i32
      %c0_i32_82 = arith.constant 0 : i32
      %134 = arith.maxsi %133, %c0_i32_82 : i32
      %c0_i32_83 = arith.constant 0 : i32
      %c0_i32_84 = arith.constant 0 : i32
      %c0_i32_85 = arith.constant 0 : i32
      %135 = tpu.memref_slice %arg3[%134, %c0_i32_85] : memref<64x128xf32, #tpu.memory_space<any>> -> memref<1x128xf32, #tpu.memory_space<any>>
      %c4_i32_86 = arith.constant 4 : i32
      %c0_i32_87 = arith.constant 0 : i32
      %136 = tpu.memref_slice %arg8[%c0_i32_83, %c4_i32_86, %c0_i32_87] : memref<2x8x128xf32, #tpu.memory_space<vmem>> -> memref<1x1x128xf32, #tpu.memory_space<vmem>>
      %137 = tpu.memref_squeeze %136 : memref<1x1x128xf32, #tpu.memory_space<vmem>> -> memref<1x128xf32, #tpu.memory_space<vmem>>
      %138 = tpu.memref_slice %arg9[%c0_i32_84] : memref<2x!tpu.dma_semaphore, #tpu.memory_space<semaphore_mem>> -> memref<1x!tpu.dma_semaphore, #tpu.memory_space<semaphore_mem>>
      %139 = tpu.memref_squeeze %138 : memref<1x!tpu.dma_semaphore, #tpu.memory_space<semaphore_mem>> -> memref<!tpu.dma_semaphore, #tpu.memory_space<semaphore_mem>>
      tpu.enqueue_dma source(%135 : memref<1x128xf32, #tpu.memory_space<any>>) target(%137 : memref<1x128xf32, #tpu.memory_space<vmem>>) target_semaphore(%139 : memref<!tpu.dma_semaphore, #tpu.memory_space<semaphore_mem>>)
      %c5_i32_88 = arith.constant 5 : i32
      %140 = arith.addi %2, %c5_i32_88 : i32
      %141 = arith.index_cast %140 : i32 to index
      %142 = memref.load %arg2[%141] : memref<32xi32, #tpu.memory_space<smem>>
      %c63_i32_89 = arith.constant 63 : i32
      %143 = arith.minsi %142, %c63_i32_89 : i32
      %c0_i32_90 = arith.constant 0 : i32
      %144 = arith.maxsi %143, %c0_i32_90 : i32
      %c0_i32_91 = arith.constant 0 : i32
      %c0_i32_92 = arith.constant 0 : i32
      %c0_i32_93 = arith.constant 0 : i32
      %145 = tpu.memref_slice %arg3[%144, %c0_i32_93] : memref<64x128xf32, #tpu.memory_space<any>> -> memref<1x128xf32, #tpu.memory_space<any>>
      %c5_i32_94 = arith.constant 5 : i32
      %c0_i32_95 = arith.constant 0 : i32
      %146 = tpu.memref_slice %arg8[%c0_i32_91, %c5_i32_94, %c0_i32_95] : memref<2x8x128xf32, #tpu.memory_space<vmem>> -> memref<1x1x128xf32, #tpu.memory_space<vmem>>
      %147 = tpu.memref_squeeze %146 : memref<1x1x128xf32, #tpu.memory_space<vmem>> -> memref<1x128xf32, #tpu.memory_space<vmem>>
      %148 = tpu.memref_slice %arg9[%c0_i32_92] : memref<2x!tpu.dma_semaphore, #tpu.memory_space<semaphore_mem>> -> memref<1x!tpu.dma_semaphore, #tpu.memory_space<semaphore_mem>>
      %149 = tpu.memref_squeeze %148 : memref<1x!tpu.dma_semaphore, #tpu.memory_space<semaphore_mem>> -> memref<!tpu.dma_semaphore, #tpu.memory_space<semaphore_mem>>
      tpu.enqueue_dma source(%145 : memref<1x128xf32, #tpu.memory_space<any>>) target(%147 : memref<1x128xf32, #tpu.memory_space<vmem>>) target_semaphore(%149 : memref<!tpu.dma_semaphore, #tpu.memory_space<semaphore_mem>>)
      %c6_i32_96 = arith.constant 6 : i32
      %150 = arith.addi %2, %c6_i32_96 : i32
      %151 = arith.index_cast %150 : i32 to index
      %152 = memref.load %arg2[%151] : memref<32xi32, #tpu.memory_space<smem>>
      %c63_i32_97 = arith.constant 63 : i32
      %153 = arith.minsi %152, %c63_i32_97 : i32
      %c0_i32_98 = arith.constant 0 : i32
      %154 = arith.maxsi %153, %c0_i32_98 : i32
      %c0_i32_99 = arith.constant 0 : i32
      %c0_i32_100 = arith.constant 0 : i32
      %c0_i32_101 = arith.constant 0 : i32
      %155 = tpu.memref_slice %arg3[%154, %c0_i32_101] : memref<64x128xf32, #tpu.memory_space<any>> -> memref<1x128xf32, #tpu.memory_space<any>>
      %c6_i32_102 = arith.constant 6 : i32
      %c0_i32_103 = arith.constant 0 : i32
      %156 = tpu.memref_slice %arg8[%c0_i32_99, %c6_i32_102, %c0_i32_103] : memref<2x8x128xf32, #tpu.memory_space<vmem>> -> memref<1x1x128xf32, #tpu.memory_space<vmem>>
      %157 = tpu.memref_squeeze %156 : memref<1x1x128xf32, #tpu.memory_space<vmem>> -> memref<1x128xf32, #tpu.memory_space<vmem>>
      %158 = tpu.memref_slice %arg9[%c0_i32_100] : memref<2x!tpu.dma_semaphore, #tpu.memory_space<semaphore_mem>> -> memref<1x!tpu.dma_semaphore, #tpu.memory_space<semaphore_mem>>
      %159 = tpu.memref_squeeze %158 : memref<1x!tpu.dma_semaphore, #tpu.memory_space<semaphore_mem>> -> memref<!tpu.dma_semaphore, #tpu.memory_space<semaphore_mem>>
      tpu.enqueue_dma source(%155 : memref<1x128xf32, #tpu.memory_space<any>>) target(%157 : memref<1x128xf32, #tpu.memory_space<vmem>>) target_semaphore(%159 : memref<!tpu.dma_semaphore, #tpu.memory_space<semaphore_mem>>)
      %c7_i32_104 = arith.constant 7 : i32
      %160 = arith.addi %2, %c7_i32_104 : i32
      %161 = arith.index_cast %160 : i32 to index
      %162 = memref.load %arg2[%161] : memref<32xi32, #tpu.memory_space<smem>>
      %c63_i32_105 = arith.constant 63 : i32
      %163 = arith.minsi %162, %c63_i32_105 : i32
      %c0_i32_106 = arith.constant 0 : i32
      %164 = arith.maxsi %163, %c0_i32_106 : i32
      %c0_i32_107 = arith.constant 0 : i32
      %c0_i32_108 = arith.constant 0 : i32
      %c0_i32_109 = arith.constant 0 : i32
      %165 = tpu.memref_slice %arg3[%164, %c0_i32_109] : memref<64x128xf32, #tpu.memory_space<any>> -> memref<1x128xf32, #tpu.memory_space<any>>
      %c7_i32_110 = arith.constant 7 : i32
      %c0_i32_111 = arith.constant 0 : i32
      %166 = tpu.memref_slice %arg8[%c0_i32_107, %c7_i32_110, %c0_i32_111] : memref<2x8x128xf32, #tpu.memory_space<vmem>> -> memref<1x1x128xf32, #tpu.memory_space<vmem>>
      %167 = tpu.memref_squeeze %166 : memref<1x1x128xf32, #tpu.memory_space<vmem>> -> memref<1x128xf32, #tpu.memory_space<vmem>>
      %168 = tpu.memref_slice %arg9[%c0_i32_108] : memref<2x!tpu.dma_semaphore, #tpu.memory_space<semaphore_mem>> -> memref<1x!tpu.dma_semaphore, #tpu.memory_space<semaphore_mem>>
      %169 = tpu.memref_squeeze %168 : memref<1x!tpu.dma_semaphore, #tpu.memory_space<semaphore_mem>> -> memref<!tpu.dma_semaphore, #tpu.memory_space<semaphore_mem>>
      tpu.enqueue_dma source(%165 : memref<1x128xf32, #tpu.memory_space<any>>) target(%167 : memref<1x128xf32, #tpu.memory_space<vmem>>) target_semaphore(%169 : memref<!tpu.dma_semaphore, #tpu.memory_space<semaphore_mem>>)
    } else {
    }
    %c1_i32_5 = arith.constant 1 : i32
    %16 = arith.addi %arg1, %c1_i32_5 : i32
    %c2_i32_6 = arith.constant 2 : i32
    %17 = arith.cmpi slt, %16, %c2_i32_6 : i32
    %18 = arith.extui %17 : i1 to i32
    %c0_i32_7 = arith.constant 0 : i32
    %19 = arith.cmpi ne, %18, %c0_i32_7 : i32
    scf.if %19 {
      %c1_i32_49 = arith.constant 1 : i32
      %90 = arith.subi %c1_i32_49, %12 : i32
      %c8_i32_50 = arith.constant 8 : i32
      %91 = arith.addi %2, %c8_i32_50 : i32
      %c0_i32_51 = arith.constant 0 : i32
      %92 = arith.addi %91, %c0_i32_51 : i32
      %93 = arith.index_cast %92 : i32 to index
      %94 = memref.load %arg2[%93] : memref<32xi32, #tpu.memory_space<smem>>
      %c63_i32 = arith.constant 63 : i32
      %95 = arith.minsi %94, %c63_i32 : i32
      %c0_i32_52 = arith.constant 0 : i32
      %96 = arith.maxsi %95, %c0_i32_52 : i32
      %c0_i32_53 = arith.constant 0 : i32
      %97 = tpu.memref_slice %arg3[%96, %c0_i32_53] : memref<64x128xf32, #tpu.memory_space<any>> -> memref<1x128xf32, #tpu.memory_space<any>>
      %c0_i32_54 = arith.constant 0 : i32
      %c0_i32_55 = arith.constant 0 : i32
      %98 = tpu.memref_slice %arg8[%90, %c0_i32_54, %c0_i32_55] : memref<2x8x128xf32, #tpu.memory_space<vmem>> -> memref<1x1x128xf32, #tpu.memory_space<vmem>>
      %99 = tpu.memref_squeeze %98 : memref<1x1x128xf32, #tpu.memory_space<vmem>> -> memref<1x128xf32, #tpu.memory_space<vmem>>
      %100 = tpu.memref_slice %arg9[%90] : memref<2x!tpu.dma_semaphore, #tpu.memory_space<semaphore_mem>> -> memref<1x!tpu.dma_semaphore, #tpu.memory_space<semaphore_mem>>
      %101 = tpu.memref_squeeze %100 : memref<1x!tpu.dma_semaphore, #tpu.memory_space<semaphore_mem>> -> memref<!tpu.dma_semaphore, #tpu.memory_space<semaphore_mem>>
      tpu.enqueue_dma source(%97 : memref<1x128xf32, #tpu.memory_space<any>>) target(%99 : memref<1x128xf32, #tpu.memory_space<vmem>>) target_semaphore(%101 : memref<!tpu.dma_semaphore, #tpu.memory_space<semaphore_mem>>)
      %c1_i32_56 = arith.constant 1 : i32
      %102 = arith.addi %91, %c1_i32_56 : i32
      %103 = arith.index_cast %102 : i32 to index
      %104 = memref.load %arg2[%103] : memref<32xi32, #tpu.memory_space<smem>>
      %c63_i32_57 = arith.constant 63 : i32
      %105 = arith.minsi %104, %c63_i32_57 : i32
      %c0_i32_58 = arith.constant 0 : i32
      %106 = arith.maxsi %105, %c0_i32_58 : i32
      %c0_i32_59 = arith.constant 0 : i32
      %107 = tpu.memref_slice %arg3[%106, %c0_i32_59] : memref<64x128xf32, #tpu.memory_space<any>> -> memref<1x128xf32, #tpu.memory_space<any>>
      %c1_i32_60 = arith.constant 1 : i32
      %c0_i32_61 = arith.constant 0 : i32
      %108 = tpu.memref_slice %arg8[%90, %c1_i32_60, %c0_i32_61] : memref<2x8x128xf32, #tpu.memory_space<vmem>> -> memref<1x1x128xf32, #tpu.memory_space<vmem>>
      %109 = tpu.memref_squeeze %108 : memref<1x1x128xf32, #tpu.memory_space<vmem>> -> memref<1x128xf32, #tpu.memory_space<vmem>>
      %110 = tpu.memref_slice %arg9[%90] : memref<2x!tpu.dma_semaphore, #tpu.memory_space<semaphore_mem>> -> memref<1x!tpu.dma_semaphore, #tpu.memory_space<semaphore_mem>>
      %111 = tpu.memref_squeeze %110 : memref<1x!tpu.dma_semaphore, #tpu.memory_space<semaphore_mem>> -> memref<!tpu.dma_semaphore, #tpu.memory_space<semaphore_mem>>
      tpu.enqueue_dma source(%107 : memref<1x128xf32, #tpu.memory_space<any>>) target(%109 : memref<1x128xf32, #tpu.memory_space<vmem>>) target_semaphore(%111 : memref<!tpu.dma_semaphore, #tpu.memory_space<semaphore_mem>>)
      %c2_i32_62 = arith.constant 2 : i32
      %112 = arith.addi %91, %c2_i32_62 : i32
      %113 = arith.index_cast %112 : i32 to index
      %114 = memref.load %arg2[%113] : memref<32xi32, #tpu.memory_space<smem>>
      %c63_i32_63 = arith.constant 63 : i32
      %115 = arith.minsi %114, %c63_i32_63 : i32
      %c0_i32_64 = arith.constant 0 : i32
      %116 = arith.maxsi %115, %c0_i32_64 : i32
      %c0_i32_65 = arith.constant 0 : i32
      %117 = tpu.memref_slice %arg3[%116, %c0_i32_65] : memref<64x128xf32, #tpu.memory_space<any>> -> memref<1x128xf32, #tpu.memory_space<any>>
      %c2_i32_66 = arith.constant 2 : i32
      %c0_i32_67 = arith.constant 0 : i32
      %118 = tpu.memref_slice %arg8[%90, %c2_i32_66, %c0_i32_67] : memref<2x8x128xf32, #tpu.memory_space<vmem>> -> memref<1x1x128xf32, #tpu.memory_space<vmem>>
      %119 = tpu.memref_squeeze %118 : memref<1x1x128xf32, #tpu.memory_space<vmem>> -> memref<1x128xf32, #tpu.memory_space<vmem>>
      %120 = tpu.memref_slice %arg9[%90] : memref<2x!tpu.dma_semaphore, #tpu.memory_space<semaphore_mem>> -> memref<1x!tpu.dma_semaphore, #tpu.memory_space<semaphore_mem>>
      %121 = tpu.memref_squeeze %120 : memref<1x!tpu.dma_semaphore, #tpu.memory_space<semaphore_mem>> -> memref<!tpu.dma_semaphore, #tpu.memory_space<semaphore_mem>>
      tpu.enqueue_dma source(%117 : memref<1x128xf32, #tpu.memory_space<any>>) target(%119 : memref<1x128xf32, #tpu.memory_space<vmem>>) target_semaphore(%121 : memref<!tpu.dma_semaphore, #tpu.memory_space<semaphore_mem>>)
      %c3_i32_68 = arith.constant 3 : i32
      %122 = arith.addi %91, %c3_i32_68 : i32
      %123 = arith.index_cast %122 : i32 to index
      %124 = memref.load %arg2[%123] : memref<32xi32, #tpu.memory_space<smem>>
      %c63_i32_69 = arith.constant 63 : i32
      %125 = arith.minsi %124, %c63_i32_69 : i32
      %c0_i32_70 = arith.constant 0 : i32
      %126 = arith.maxsi %125, %c0_i32_70 : i32
      %c0_i32_71 = arith.constant 0 : i32
      %127 = tpu.memref_slice %arg3[%126, %c0_i32_71] : memref<64x128xf32, #tpu.memory_space<any>> -> memref<1x128xf32, #tpu.memory_space<any>>
      %c3_i32_72 = arith.constant 3 : i32
      %c0_i32_73 = arith.constant 0 : i32
      %128 = tpu.memref_slice %arg8[%90, %c3_i32_72, %c0_i32_73] : memref<2x8x128xf32, #tpu.memory_space<vmem>> -> memref<1x1x128xf32, #tpu.memory_space<vmem>>
      %129 = tpu.memref_squeeze %128 : memref<1x1x128xf32, #tpu.memory_space<vmem>> -> memref<1x128xf32, #tpu.memory_space<vmem>>
      %130 = tpu.memref_slice %arg9[%90] : memref<2x!tpu.dma_semaphore, #tpu.memory_space<semaphore_mem>> -> memref<1x!tpu.dma_semaphore, #tpu.memory_space<semaphore_mem>>
      %131 = tpu.memref_squeeze %130 : memref<1x!tpu.dma_semaphore, #tpu.memory_space<semaphore_mem>> -> memref<!tpu.dma_semaphore, #tpu.memory_space<semaphore_mem>>
      tpu.enqueue_dma source(%127 : memref<1x128xf32, #tpu.memory_space<any>>) target(%129 : memref<1x128xf32, #tpu.memory_space<vmem>>) target_semaphore(%131 : memref<!tpu.dma_semaphore, #tpu.memory_space<semaphore_mem>>)
      %c4_i32_74 = arith.constant 4 : i32
      %132 = arith.addi %91, %c4_i32_74 : i32
      %133 = arith.index_cast %132 : i32 to index
      %134 = memref.load %arg2[%133] : memref<32xi32, #tpu.memory_space<smem>>
      %c63_i32_75 = arith.constant 63 : i32
      %135 = arith.minsi %134, %c63_i32_75 : i32
      %c0_i32_76 = arith.constant 0 : i32
      %136 = arith.maxsi %135, %c0_i32_76 : i32
      %c0_i32_77 = arith.constant 0 : i32
      %137 = tpu.memref_slice %arg3[%136, %c0_i32_77] : memref<64x128xf32, #tpu.memory_space<any>> -> memref<1x128xf32, #tpu.memory_space<any>>
      %c4_i32_78 = arith.constant 4 : i32
      %c0_i32_79 = arith.constant 0 : i32
      %138 = tpu.memref_slice %arg8[%90, %c4_i32_78, %c0_i32_79] : memref<2x8x128xf32, #tpu.memory_space<vmem>> -> memref<1x1x128xf32, #tpu.memory_space<vmem>>
      %139 = tpu.memref_squeeze %138 : memref<1x1x128xf32, #tpu.memory_space<vmem>> -> memref<1x128xf32, #tpu.memory_space<vmem>>
      %140 = tpu.memref_slice %arg9[%90] : memref<2x!tpu.dma_semaphore, #tpu.memory_space<semaphore_mem>> -> memref<1x!tpu.dma_semaphore, #tpu.memory_space<semaphore_mem>>
      %141 = tpu.memref_squeeze %140 : memref<1x!tpu.dma_semaphore, #tpu.memory_space<semaphore_mem>> -> memref<!tpu.dma_semaphore, #tpu.memory_space<semaphore_mem>>
      tpu.enqueue_dma source(%137 : memref<1x128xf32, #tpu.memory_space<any>>) target(%139 : memref<1x128xf32, #tpu.memory_space<vmem>>) target_semaphore(%141 : memref<!tpu.dma_semaphore, #tpu.memory_space<semaphore_mem>>)
      %c5_i32_80 = arith.constant 5 : i32
      %142 = arith.addi %91, %c5_i32_80 : i32
      %143 = arith.index_cast %142 : i32 to index
      %144 = memref.load %arg2[%143] : memref<32xi32, #tpu.memory_space<smem>>
      %c63_i32_81 = arith.constant 63 : i32
      %145 = arith.minsi %144, %c63_i32_81 : i32
      %c0_i32_82 = arith.constant 0 : i32
      %146 = arith.maxsi %145, %c0_i32_82 : i32
      %c0_i32_83 = arith.constant 0 : i32
      %147 = tpu.memref_slice %arg3[%146, %c0_i32_83] : memref<64x128xf32, #tpu.memory_space<any>> -> memref<1x128xf32, #tpu.memory_space<any>>
      %c5_i32_84 = arith.constant 5 : i32
      %c0_i32_85 = arith.constant 0 : i32
      %148 = tpu.memref_slice %arg8[%90, %c5_i32_84, %c0_i32_85] : memref<2x8x128xf32, #tpu.memory_space<vmem>> -> memref<1x1x128xf32, #tpu.memory_space<vmem>>
      %149 = tpu.memref_squeeze %148 : memref<1x1x128xf32, #tpu.memory_space<vmem>> -> memref<1x128xf32, #tpu.memory_space<vmem>>
      %150 = tpu.memref_slice %arg9[%90] : memref<2x!tpu.dma_semaphore, #tpu.memory_space<semaphore_mem>> -> memref<1x!tpu.dma_semaphore, #tpu.memory_space<semaphore_mem>>
      %151 = tpu.memref_squeeze %150 : memref<1x!tpu.dma_semaphore, #tpu.memory_space<semaphore_mem>> -> memref<!tpu.dma_semaphore, #tpu.memory_space<semaphore_mem>>
      tpu.enqueue_dma source(%147 : memref<1x128xf32, #tpu.memory_space<any>>) target(%149 : memref<1x128xf32, #tpu.memory_space<vmem>>) target_semaphore(%151 : memref<!tpu.dma_semaphore, #tpu.memory_space<semaphore_mem>>)
      %c6_i32_86 = arith.constant 6 : i32
      %152 = arith.addi %91, %c6_i32_86 : i32
      %153 = arith.index_cast %152 : i32 to index
      %154 = memref.load %arg2[%153] : memref<32xi32, #tpu.memory_space<smem>>
      %c63_i32_87 = arith.constant 63 : i32
      %155 = arith.minsi %154, %c63_i32_87 : i32
      %c0_i32_88 = arith.constant 0 : i32
      %156 = arith.maxsi %155, %c0_i32_88 : i32
      %c0_i32_89 = arith.constant 0 : i32
      %157 = tpu.memref_slice %arg3[%156, %c0_i32_89] : memref<64x128xf32, #tpu.memory_space<any>> -> memref<1x128xf32, #tpu.memory_space<any>>
      %c6_i32_90 = arith.constant 6 : i32
      %c0_i32_91 = arith.constant 0 : i32
      %158 = tpu.memref_slice %arg8[%90, %c6_i32_90, %c0_i32_91] : memref<2x8x128xf32, #tpu.memory_space<vmem>> -> memref<1x1x128xf32, #tpu.memory_space<vmem>>
      %159 = tpu.memref_squeeze %158 : memref<1x1x128xf32, #tpu.memory_space<vmem>> -> memref<1x128xf32, #tpu.memory_space<vmem>>
      %160 = tpu.memref_slice %arg9[%90] : memref<2x!tpu.dma_semaphore, #tpu.memory_space<semaphore_mem>> -> memref<1x!tpu.dma_semaphore, #tpu.memory_space<semaphore_mem>>
      %161 = tpu.memref_squeeze %160 : memref<1x!tpu.dma_semaphore, #tpu.memory_space<semaphore_mem>> -> memref<!tpu.dma_semaphore, #tpu.memory_space<semaphore_mem>>
      tpu.enqueue_dma source(%157 : memref<1x128xf32, #tpu.memory_space<any>>) target(%159 : memref<1x128xf32, #tpu.memory_space<vmem>>) target_semaphore(%161 : memref<!tpu.dma_semaphore, #tpu.memory_space<semaphore_mem>>)
      %c7_i32_92 = arith.constant 7 : i32
      %162 = arith.addi %91, %c7_i32_92 : i32
      %163 = arith.index_cast %162 : i32 to index
      %164 = memref.load %arg2[%163] : memref<32xi32, #tpu.memory_space<smem>>
      %c63_i32_93 = arith.constant 63 : i32
      %165 = arith.minsi %164, %c63_i32_93 : i32
      %c0_i32_94 = arith.constant 0 : i32
      %166 = arith.maxsi %165, %c0_i32_94 : i32
      %c0_i32_95 = arith.constant 0 : i32
      %167 = tpu.memref_slice %arg3[%166, %c0_i32_95] : memref<64x128xf32, #tpu.memory_space<any>> -> memref<1x128xf32, #tpu.memory_space<any>>
      %c7_i32_96 = arith.constant 7 : i32
      %c0_i32_97 = arith.constant 0 : i32
      %168 = tpu.memref_slice %arg8[%90, %c7_i32_96, %c0_i32_97] : memref<2x8x128xf32, #tpu.memory_space<vmem>> -> memref<1x1x128xf32, #tpu.memory_space<vmem>>
      %169 = tpu.memref_squeeze %168 : memref<1x1x128xf32, #tpu.memory_space<vmem>> -> memref<1x128xf32, #tpu.memory_space<vmem>>
      %170 = tpu.memref_slice %arg9[%90] : memref<2x!tpu.dma_semaphore, #tpu.memory_space<semaphore_mem>> -> memref<1x!tpu.dma_semaphore, #tpu.memory_space<semaphore_mem>>
      %171 = tpu.memref_squeeze %170 : memref<1x!tpu.dma_semaphore, #tpu.memory_space<semaphore_mem>> -> memref<!tpu.dma_semaphore, #tpu.memory_space<semaphore_mem>>
      tpu.enqueue_dma source(%167 : memref<1x128xf32, #tpu.memory_space<any>>) target(%169 : memref<1x128xf32, #tpu.memory_space<vmem>>) target_semaphore(%171 : memref<!tpu.dma_semaphore, #tpu.memory_space<semaphore_mem>>)
    } else {
    }
    %c0_i32_8 = arith.constant 0 : i32
    %c0_i32_9 = arith.constant 0 : i32
    %20 = tpu.memref_slice %arg3[%c0_i32_8, %c0_i32_9] : memref<64x128xf32, #tpu.memory_space<any>> -> memref<1x128xf32, #tpu.memory_space<any>>
    %c0_i32_10 = arith.constant 0 : i32
    %c0_i32_11 = arith.constant 0 : i32
    %21 = tpu.memref_slice %arg8[%12, %c0_i32_10, %c0_i32_11] : memref<2x8x128xf32, #tpu.memory_space<vmem>> -> memref<1x1x128xf32, #tpu.memory_space<vmem>>
    %22 = tpu.memref_squeeze %21 : memref<1x1x128xf32, #tpu.memory_space<vmem>> -> memref<1x128xf32, #tpu.memory_space<vmem>>
    %23 = tpu.memref_slice %arg9[%12] : memref<2x!tpu.dma_semaphore, #tpu.memory_space<semaphore_mem>> -> memref<1x!tpu.dma_semaphore, #tpu.memory_space<semaphore_mem>>
    %24 = tpu.memref_squeeze %23 : memref<1x!tpu.dma_semaphore, #tpu.memory_space<semaphore_mem>> -> memref<!tpu.dma_semaphore, #tpu.memory_space<semaphore_mem>>
    tpu.wait_dma2 semaphore(%24 : memref<!tpu.dma_semaphore, #tpu.memory_space<semaphore_mem>>) src(%20 : memref<1x128xf32, #tpu.memory_space<any>>) dst(%22 : memref<1x128xf32, #tpu.memory_space<vmem>>)
    %c0_i32_12 = arith.constant 0 : i32
    %c0_i32_13 = arith.constant 0 : i32
    %25 = tpu.memref_slice %arg3[%c0_i32_12, %c0_i32_13] : memref<64x128xf32, #tpu.memory_space<any>> -> memref<1x128xf32, #tpu.memory_space<any>>
    %c1_i32_14 = arith.constant 1 : i32
    %c0_i32_15 = arith.constant 0 : i32
    %26 = tpu.memref_slice %arg8[%12, %c1_i32_14, %c0_i32_15] : memref<2x8x128xf32, #tpu.memory_space<vmem>> -> memref<1x1x128xf32, #tpu.memory_space<vmem>>
    %27 = tpu.memref_squeeze %26 : memref<1x1x128xf32, #tpu.memory_space<vmem>> -> memref<1x128xf32, #tpu.memory_space<vmem>>
    %28 = tpu.memref_slice %arg9[%12] : memref<2x!tpu.dma_semaphore, #tpu.memory_space<semaphore_mem>> -> memref<1x!tpu.dma_semaphore, #tpu.memory_space<semaphore_mem>>
    %29 = tpu.memref_squeeze %28 : memref<1x!tpu.dma_semaphore, #tpu.memory_space<semaphore_mem>> -> memref<!tpu.dma_semaphore, #tpu.memory_space<semaphore_mem>>
    tpu.wait_dma2 semaphore(%29 : memref<!tpu.dma_semaphore, #tpu.memory_space<semaphore_mem>>) src(%25 : memref<1x128xf32, #tpu.memory_space<any>>) dst(%27 : memref<1x128xf32, #tpu.memory_space<vmem>>)
    %c0_i32_16 = arith.constant 0 : i32
    %c0_i32_17 = arith.constant 0 : i32
    %30 = tpu.memref_slice %arg3[%c0_i32_16, %c0_i32_17] : memref<64x128xf32, #tpu.memory_space<any>> -> memref<1x128xf32, #tpu.memory_space<any>>
    %c2_i32_18 = arith.constant 2 : i32
    %c0_i32_19 = arith.constant 0 : i32
    %31 = tpu.memref_slice %arg8[%12, %c2_i32_18, %c0_i32_19] : memref<2x8x128xf32, #tpu.memory_space<vmem>> -> memref<1x1x128xf32, #tpu.memory_space<vmem>>
    %32 = tpu.memref_squeeze %31 : memref<1x1x128xf32, #tpu.memory_space<vmem>> -> memref<1x128xf32, #tpu.memory_space<vmem>>
    %33 = tpu.memref_slice %arg9[%12] : memref<2x!tpu.dma_semaphore, #tpu.memory_space<semaphore_mem>> -> memref<1x!tpu.dma_semaphore, #tpu.memory_space<semaphore_mem>>
    %34 = tpu.memref_squeeze %33 : memref<1x!tpu.dma_semaphore, #tpu.memory_space<semaphore_mem>> -> memref<!tpu.dma_semaphore, #tpu.memory_space<semaphore_mem>>
    tpu.wait_dma2 semaphore(%34 : memref<!tpu.dma_semaphore, #tpu.memory_space<semaphore_mem>>) src(%30 : memref<1x128xf32, #tpu.memory_space<any>>) dst(%32 : memref<1x128xf32, #tpu.memory_space<vmem>>)
    %c0_i32_20 = arith.constant 0 : i32
    %c0_i32_21 = arith.constant 0 : i32
    %35 = tpu.memref_slice %arg3[%c0_i32_20, %c0_i32_21] : memref<64x128xf32, #tpu.memory_space<any>> -> memref<1x128xf32, #tpu.memory_space<any>>
    %c3_i32 = arith.constant 3 : i32
    %c0_i32_22 = arith.constant 0 : i32
    %36 = tpu.memref_slice %arg8[%12, %c3_i32, %c0_i32_22] : memref<2x8x128xf32, #tpu.memory_space<vmem>> -> memref<1x1x128xf32, #tpu.memory_space<vmem>>
    %37 = tpu.memref_squeeze %36 : memref<1x1x128xf32, #tpu.memory_space<vmem>> -> memref<1x128xf32, #tpu.memory_space<vmem>>
    %38 = tpu.memref_slice %arg9[%12] : memref<2x!tpu.dma_semaphore, #tpu.memory_space<semaphore_mem>> -> memref<1x!tpu.dma_semaphore, #tpu.memory_space<semaphore_mem>>
    %39 = tpu.memref_squeeze %38 : memref<1x!tpu.dma_semaphore, #tpu.memory_space<semaphore_mem>> -> memref<!tpu.dma_semaphore, #tpu.memory_space<semaphore_mem>>
    tpu.wait_dma2 semaphore(%39 : memref<!tpu.dma_semaphore, #tpu.memory_space<semaphore_mem>>) src(%35 : memref<1x128xf32, #tpu.memory_space<any>>) dst(%37 : memref<1x128xf32, #tpu.memory_space<vmem>>)
    %c0_i32_23 = arith.constant 0 : i32
    %c0_i32_24 = arith.constant 0 : i32
    %40 = tpu.memref_slice %arg3[%c0_i32_23, %c0_i32_24] : memref<64x128xf32, #tpu.memory_space<any>> -> memref<1x128xf32, #tpu.memory_space<any>>
    %c4_i32 = arith.constant 4 : i32
    %c0_i32_25 = arith.constant 0 : i32
    %41 = tpu.memref_slice %arg8[%12, %c4_i32, %c0_i32_25] : memref<2x8x128xf32, #tpu.memory_space<vmem>> -> memref<1x1x128xf32, #tpu.memory_space<vmem>>
    %42 = tpu.memref_squeeze %41 : memref<1x1x128xf32, #tpu.memory_space<vmem>> -> memref<1x128xf32, #tpu.memory_space<vmem>>
    %43 = tpu.memref_slice %arg9[%12] : memref<2x!tpu.dma_semaphore, #tpu.memory_space<semaphore_mem>> -> memref<1x!tpu.dma_semaphore, #tpu.memory_space<semaphore_mem>>
    %44 = tpu.memref_squeeze %43 : memref<1x!tpu.dma_semaphore, #tpu.memory_space<semaphore_mem>> -> memref<!tpu.dma_semaphore, #tpu.memory_space<semaphore_mem>>
    tpu.wait_dma2 semaphore(%44 : memref<!tpu.dma_semaphore, #tpu.memory_space<semaphore_mem>>) src(%40 : memref<1x128xf32, #tpu.memory_space<any>>) dst(%42 : memref<1x128xf32, #tpu.memory_space<vmem>>)
    %c0_i32_26 = arith.constant 0 : i32
    %c0_i32_27 = arith.constant 0 : i32
    %45 = tpu.memref_slice %arg3[%c0_i32_26, %c0_i32_27] : memref<64x128xf32, #tpu.memory_space<any>> -> memref<1x128xf32, #tpu.memory_space<any>>
    %c5_i32 = arith.constant 5 : i32
    %c0_i32_28 = arith.constant 0 : i32
    %46 = tpu.memref_slice %arg8[%12, %c5_i32, %c0_i32_28] : memref<2x8x128xf32, #tpu.memory_space<vmem>> -> memref<1x1x128xf32, #tpu.memory_space<vmem>>
    %47 = tpu.memref_squeeze %46 : memref<1x1x128xf32, #tpu.memory_space<vmem>> -> memref<1x128xf32, #tpu.memory_space<vmem>>
    %48 = tpu.memref_slice %arg9[%12] : memref<2x!tpu.dma_semaphore, #tpu.memory_space<semaphore_mem>> -> memref<1x!tpu.dma_semaphore, #tpu.memory_space<semaphore_mem>>
    %49 = tpu.memref_squeeze %48 : memref<1x!tpu.dma_semaphore, #tpu.memory_space<semaphore_mem>> -> memref<!tpu.dma_semaphore, #tpu.memory_space<semaphore_mem>>
    tpu.wait_dma2 semaphore(%49 : memref<!tpu.dma_semaphore, #tpu.memory_space<semaphore_mem>>) src(%45 : memref<1x128xf32, #tpu.memory_space<any>>) dst(%47 : memref<1x128xf32, #tpu.memory_space<vmem>>)
    %c0_i32_29 = arith.constant 0 : i32
    %c0_i32_30 = arith.constant 0 : i32
    %50 = tpu.memref_slice %arg3[%c0_i32_29, %c0_i32_30] : memref<64x128xf32, #tpu.memory_space<any>> -> memref<1x128xf32, #tpu.memory_space<any>>
    %c6_i32 = arith.constant 6 : i32
    %c0_i32_31 = arith.constant 0 : i32
    %51 = tpu.memref_slice %arg8[%12, %c6_i32, %c0_i32_31] : memref<2x8x128xf32, #tpu.memory_space<vmem>> -> memref<1x1x128xf32, #tpu.memory_space<vmem>>
    %52 = tpu.memref_squeeze %51 : memref<1x1x128xf32, #tpu.memory_space<vmem>> -> memref<1x128xf32, #tpu.memory_space<vmem>>
    %53 = tpu.memref_slice %arg9[%12] : memref<2x!tpu.dma_semaphore, #tpu.memory_space<semaphore_mem>> -> memref<1x!tpu.dma_semaphore, #tpu.memory_space<semaphore_mem>>
    %54 = tpu.memref_squeeze %53 : memref<1x!tpu.dma_semaphore, #tpu.memory_space<semaphore_mem>> -> memref<!tpu.dma_semaphore, #tpu.memory_space<semaphore_mem>>
    tpu.wait_dma2 semaphore(%54 : memref<!tpu.dma_semaphore, #tpu.memory_space<semaphore_mem>>) src(%50 : memref<1x128xf32, #tpu.memory_space<any>>) dst(%52 : memref<1x128xf32, #tpu.memory_space<vmem>>)
    %c0_i32_32 = arith.constant 0 : i32
    %c0_i32_33 = arith.constant 0 : i32
    %55 = tpu.memref_slice %arg3[%c0_i32_32, %c0_i32_33] : memref<64x128xf32, #tpu.memory_space<any>> -> memref<1x128xf32, #tpu.memory_space<any>>
    %c7_i32 = arith.constant 7 : i32
    %c0_i32_34 = arith.constant 0 : i32
    %56 = tpu.memref_slice %arg8[%12, %c7_i32, %c0_i32_34] : memref<2x8x128xf32, #tpu.memory_space<vmem>> -> memref<1x1x128xf32, #tpu.memory_space<vmem>>
    %57 = tpu.memref_squeeze %56 : memref<1x1x128xf32, #tpu.memory_space<vmem>> -> memref<1x128xf32, #tpu.memory_space<vmem>>
    %58 = tpu.memref_slice %arg9[%12] : memref<2x!tpu.dma_semaphore, #tpu.memory_space<semaphore_mem>> -> memref<1x!tpu.dma_semaphore, #tpu.memory_space<semaphore_mem>>
    %59 = tpu.memref_squeeze %58 : memref<1x!tpu.dma_semaphore, #tpu.memory_space<semaphore_mem>> -> memref<!tpu.dma_semaphore, #tpu.memory_space<semaphore_mem>>
    tpu.wait_dma2 semaphore(%59 : memref<!tpu.dma_semaphore, #tpu.memory_space<semaphore_mem>>) src(%55 : memref<1x128xf32, #tpu.memory_space<any>>) dst(%57 : memref<1x128xf32, #tpu.memory_space<vmem>>)
    %60 = arith.index_cast %12 : i32 to index
    %c0 = arith.constant 0 : index
    %c0_35 = arith.constant 0 : index
    %61 = vector.load %arg8[%60, %c0, %c0_35] : memref<2x8x128xf32, #tpu.memory_space<vmem>>, vector<1x8x128xf32>
    %62 = vector.shape_cast %61 : vector<1x8x128xf32> to vector<8x128xf32>
    %c0_36 = arith.constant 0 : index
    %c0_37 = arith.constant 0 : index
    %63 = vector.load %arg4[%c0_36, %c0_37] : memref<8x128xf32, #tpu.memory_space<vmem>>, vector<8x128xf32>
    %64 = arith.addf %62, %63 : vector<8x128xf32>
    %cst = arith.constant dense<0.000000e+00> : vector<8xf32>
    %65 = vector.multi_reduction <add>, %64, %cst [1] : vector<8x128xf32> to vector<8xf32>
    %66 = vector.shape_cast %65 : vector<8xf32> to vector<8x1xf32>
    %cst_38 = arith.constant 1.280000e+02 : f32
    %67 = vector.broadcast %cst_38 : f32 to vector<8x1xf32>
    %68 = arith.divf %66, %67 : vector<8x1xf32>
    %69 = vector.broadcast %68 : vector<8x1xf32> to vector<8x128xf32>
    %70 = arith.subf %64, %69 : vector<8x128xf32>
    %71 = arith.mulf %70, %70 : vector<8x128xf32>
    %cst_39 = arith.constant dense<0.000000e+00> : vector<8xf32>
    %72 = vector.multi_reduction <add>, %71, %cst_39 [1] : vector<8x128xf32> to vector<8xf32>
    %73 = vector.shape_cast %72 : vector<8xf32> to vector<8x1xf32>
    %cst_40 = arith.constant 1.280000e+02 : f32
    %74 = vector.broadcast %cst_40 : f32 to vector<8x1xf32>
    %75 = arith.divf %73, %74 : vector<8x1xf32>
    %cst_41 = arith.constant 9.99999993E-9 : f32
    %76 = vector.broadcast %cst_41 : f32 to vector<8x1xf32>
    %77 = arith.addf %75, %76 : vector<8x1xf32>
    %78 = math.rsqrt %77 : vector<8x1xf32>
    %79 = vector.broadcast %78 : vector<8x1xf32> to vector<8x128xf32>
    %80 = arith.mulf %70, %79 : vector<8x128xf32>
    %c0_42 = arith.constant 0 : index
    %c0_43 = arith.constant 0 : index
    %81 = vector.load %arg5[%c0_42, %c0_43] : memref<1x128xf32, #tpu.memory_space<vmem>>, vector<1x128xf32>
    %82 = vector.broadcast %81 : vector<1x128xf32> to vector<8x128xf32>
    %83 = arith.mulf %80, %82 : vector<8x128xf32>
    %c0_44 = arith.constant 0 : index
    %c0_45 = arith.constant 0 : index
    %84 = vector.load %arg6[%c0_44, %c0_45] : memref<1x128xf32, #tpu.memory_space<vmem>>, vector<1x128xf32>
    %85 = vector.broadcast %84 : vector<1x128xf32> to vector<8x128xf32>
    %86 = arith.addf %83, %85 : vector<8x128xf32>
    %c0_46 = arith.constant 0 : index
    %c0_47 = arith.constant 0 : index
    %c0_48 = arith.constant 0 : index
    %87 = vector.load %arg7[%c0_46, %c0_47, %c0_48] : memref<1x8x128xf32, #tpu.memory_space<vmem>>, vector<1x8x128xf32>
    %88 = vector.shape_cast %87 : vector<1x8x128xf32> to vector<8x128xf32>
    %89 = vector.shape_cast %86 : vector<8x128xf32> to vector<1x8x128xf32>
    tpu.vector_store %arg7[%c0_46, %c0_47, %c0_48], %89 {strides = array<i32>} : memref<1x8x128xf32, #tpu.memory_space<vmem>>, vector<1x8x128xf32>,
    return
  }
  func.func @transform_1(%arg0: i32, %arg1: i32, %arg2: memref<32xi32, #tpu.memory_space<smem>>) -> (i32, i32) {
    %c0_i32 = arith.constant 0 : i32
    %c0_i32_0 = arith.constant 0 : i32
    return %arg1, %c0_i32 : i32, i32
  }
  func.func @transform_2(%arg0: i32, %arg1: i32, %arg2: memref<32xi32, #tpu.memory_space<smem>>) -> (i32, i32) {
    %c0_i32 = arith.constant 0 : i32
    %c0_i32_0 = arith.constant 0 : i32
    %c0_i32_1 = arith.constant 0 : i32
    return %c0_i32, %c0_i32_0 : i32, i32
  }
  func.func @transform_3(%arg0: i32, %arg1: i32, %arg2: memref<32xi32, #tpu.memory_space<smem>>) -> (i32, i32) {
    %c0_i32 = arith.constant 0 : i32
    %c0_i32_0 = arith.constant 0 : i32
    %c0_i32_1 = arith.constant 0 : i32
    return %c0_i32, %c0_i32_0 : i32, i32
  }
  func.func @transform_4(%arg0: i32, %arg1: i32, %arg2: memref<32xi32, #tpu.memory_space<smem>>) -> (i32, i32, i32) {
    %c0_i32 = arith.constant 0 : i32
    %c0_i32_0 = arith.constant 0 : i32
    return %arg0, %arg1, %c0_i32 : i32, i32, i32
  }
}

</mosaic_0001>

<bundles_post_ra>
// kernel: tpu_custom_call.1
= control target key start
LH: loop header
LB: loop body
LE: loop exit
PB: predicated region body
PF: predicated region fallthrough
CT: control target
= control target key end

     0   :  { %s1686_s18 = smov [#allocation5]   ;;  %s2460_s0 = inlined_call_operand.hbm [shape: s32[32], index: 0, kind: input, shape index: {}]   ;;  %s2461_s1 = inlined_call_operand.hbm [shape: f32[64,128], index: 1, kind: input, shape index: {}]   ;;  %s2462_s2 = inlined_call_operand.hbm [shape: f32[32,128], index: 2, kind: input, shape index: {}]   ;;  %s2463_s3 = inlined_call_operand.vmem [shape: f32[1,128], index: 3, kind: input, shape index: {}]   ;;  %s2464_s4 = inlined_call_operand.vmem [shape: f32[1,128], index: 4, kind: input, shape index: {}]   ;;  %s2465_s5 = inlined_call_operand.hbm [shape: f32[2,16,128], index: 5, kind: output, shape index: {}]  }
   0x1   :  { %2480 = sst [smem:[#allocation76_spill]] %s2462_s2 }
   0x2   :  { %2481 = sst [smem:[#allocation77_spill]] %s2463_s3 }
   0x3   :  { %2482 = sst [smem:[#allocation78_spill]] %s2464_s4 }
   0x4   :  { %2483 = sst [smem:[#allocation79_spill]] %s2465_s5 }
   0x5   :  { %11 = dma.hbm_to_smem %s2460_s0, 16, %s1686_s18, [#allocation4] }
   0x6   :  { %1630 = dma.done.wait [#allocation4], 16 }
   0x7   :  { %1631 = vsyncadd [#allocation4], 4294967280 }
   0x8   :  { %13 = sfence }
   0x9   :  { %14 = vsyncpa [#allocation7], 0 }
   0xa   :  { %16 = vsyncpa [#allocation7 + $0x1], 0 }
   0xb   :  { %17 = vsyncpa [#allocation8], 0 }
   0xc   :  { %19 = vsyncpa [#allocation8 + $0x1], 0  ;;  %s1730_s21 = smov 0   ;;  %s1732_s22 = smov 0  }
   0xd   :  { %s1734_s23 = smov 0   ;;  %s1736_s24 = smov 0  }
   0xe   :  { %s1738_s25 = smov 0   ;;  %s1740_s26 = smov 0  }
   0xf   :  { %s1742_s0 = smov 0   ;;  %s1744_s27 = smov 0  }
  0x10   :  { %s1746_s28 = smov 0   ;;  %s1748_s29 = smov 0  }
  0x11   :  { %s1750_s30 = smov 0  }
  0x12 LB: > { %2484 = sst [smem:[#allocation64_spill]] %s1644_s21  ;;  %s781_s6 = sadd.s32 4294967295, %s1684_s30   ;;  %s1684_s30 = sphi %s1750_s30, %s25_s30   ;;  %s1680_s29 = sphi %s1748_s29, %s2531_s29   ;;  %s1676_s28 = sphi %s1746_s28, %s2530_s28   ;;  %s1672_s27 = sphi %s1744_s27, %s2529_s27   ;;  %s1668_s0 = sphi %s1742_s0, %s2528_s0   ;;  %s1664_s26 = sphi %s1740_s26, %s2527_s26   ;;  %s1660_s25 = sphi %s1738_s25, %s2526_s25   ;;  %s1656_s24 = sphi %s1736_s24, %s2525_s24   ;;  %s1652_s23 = sphi %s1734_s23, %s2524_s23   ;;  %s1648_s22 = sphi %s1732_s22, %s2533_s22   ;;  %s1644_s21 = sphi %s1730_s21, %s2532_s21  }
  0x13   : > { %2485 = sst [smem:[#allocation65_spill]] %s1652_s23  ;;  %s782_s7 = sadd.s32 4294967294, %s1684_s30  }
  0x14   : > { %2486 = sst [smem:[#allocation66_spill]] %s1660_s25  ;;  %s34_s8 = sadd.s32 1, %s1676_s28 }
  0x15   : > { %2487 = sst [smem:[#allocation67_spill]] %s1664_s26  ;;  %s37_s9 = sadd.s32 1, %s1680_s29 }
  0x16   : > { %2488 = sst [smem:[#allocation68_spill]] %s1676_s28  ;;  %p35_p0 = scmp.ge.s32.totalorder %s34_s8, 2 }
  0x17   : > { %2489 = sst [smem:[#allocation69_spill]] %s1680_s29  ;;  %s44_s10 = sadd.s32 1, %s1664_s26 }
  0x18   : > { %2490 = sst [smem:[#allocation70_spill]] %s1684_s30  ;;  %p51_p1 = scmp.ne.s32.totalorder %s1664_s26, %s1660_s25 }
  0x19   : > { %p52_p2 = scmp.eq.s32.totalorder %s1684_s30, 0  ;;  %s2535_s8 = smov (%p35_p0, %s34_s8), 0 }
  0x1a   : > { %2491 = sst [smem:[#allocation71_spill]] %s2535_s8  ;;  %s2537_s9 = smov (!%p35_p0, %s37_s9), %s1680_s29 }
  0x1b   : > { %s41_s11 = ssub.s32 %s1676_s28, %s2535_s8  ;;  %p1796_p3 = por %p52_p2, %p51_p1 }
  0x1c   : > { %p39_p4 = scmp.ge.s32.totalorder %s2537_s9, 2  ;;  %p42_p5 = scmp.eq.s32.totalorder %s41_s11, 0 }
  0x1d   : > { %p57_p6 = scmp.ne.s32.totalorder %s1660_s25, %s1656_s24  ;;  %p58_p7 = scmp.eq.s32.totalorder %s781_s6, 0 }
  0x1e   : > { %s2539_s9 = smov (%p39_p4, %s2537_s9), 0  ;;  %s114_s17 = sadd.s32 1, %s1652_s23 }
  0x1f   : > { %2493 = sst [smem:[#allocation72_spill]] %s2539_s9  ;;  %p1806_p8 = por %p58_p7, %p57_p6 }
  0x20   : > { %s1804_s13 = scalar_select %p42_p5, %s1664_s26, %s44_s10  }
  0x21   : > { %s109_s15 = ssub.s32 %s1680_s29, %s2539_s9  ;;  %p124_p10 = scmp.ne.s32.totalorder %s1652_s23, %s1648_s22 }
  0x22   : > { %2494 = sst [smem:[#allocation73_spill]] %s1804_s13  ;;  %s111_s16 = sor.u32 %s109_s15, %s41_s11 }
  0x23   : > { %p112_p9 = scmp.eq.s32.totalorder %s111_s16, 0  ;;  %p125_p11 = scmp.eq.s32.totalorder %s781_s6, 3 }
  0x24   : > { %p130_p12 = scmp.ne.s32.totalorder %s1648_s22, %s1644_s21  ;;  %p131_p0 = scmp.eq.s32.totalorder %s782_s7, 3 }
  0x25   : > { %s1818_s18 = scalar_select %p112_p9, %s1652_s23, %s114_s17  }
  0x26   : > { %p1820_p13 = por %p125_p11, %p124_p10  ;;  %p1005_p1 = scmp.lt.s32.totalorder %s1684_s30, 4 }
  0x27   : > { %2496 = sst [smem:[#allocation74_spill]] %s1818_s18  ;;  %p1825_p2 = por %p131_p0, %p130_p12 }
  0x28   : > { %s2497_s19 = scalar_select %p1820_p13, 1, 0 }
  0x29   : > { %s2498_s20 = scalar_select %p1825_p2, 1, 0 }
  0x2a   : > { %s157_s24 = sand.u32 1, %s1664_s26   ;;  %s786_s11 = sshll.u32 %s1676_s28, 7 }
  0x2b   : > { %2499 = sst [smem:[#allocation75_spill]] %s2498_s20  ;;  %s785_s10 = sshll.u32 %s157_s24, 3 }
  0x2c   : > { %s2500_s2 = sld [smem:[#allocation76_spill]]  ;;  %s161_s9 = scalar_lea.vmem [#allocation6], %s785_s10 }
  0x2d   : > { %s168_s17 = sshll.u32 %s161_s9, 4  ;;  %p1836_p4 = pnand %p1005_p1, %p1796_p3  ;;  %s169_s17 = int_to_ptr.vmem [resolvable:$true] %s168_s17 }
  0x2e   : > { %p787_p5 = scmp.ge.s32.totalorder %s1684_s30, 1  ;;  %p173_p6 = scmp.lt.s32.totalorder %s1684_s30, 5 }
  0x2f   : > { %s158_s7 = scalar_lea.sflag [#allocation7], %s157_s24  ;;  %p1118_p7 = pneg %p1836_p4 }
  0x30   : > { %s1129_s29 = scalar_lea.vmem %s169_s17, 128  ;;  %s1687_s15 = smov [#allocation6]  }
  0x31   : > { %p1130_p9 = scmp.ne.s32.totalorder %s169_s17, %s1129_s29 }
  0x32   : > { %s166_s6 = scalar_lea.hbm %s2500_s2, %s786_s11  ;;  %s1134_s11 = sshll.u32 %s1687_s15, 4  ;;  %s1135_s11 = int_to_ptr.vmem [resolvable:$false] %s1134_s11 }
  0x33   : > { %p1132_p10 = pnand %p1130_p9, %p1118_p7  ;;  %s1136_s9 = scalar_lea.vmem %s1135_s11, 256 }
  0x34   : > { %p1137_p12 = scmp.lt.s32.totalorder %s169_s17, %s1135_s11  ;;  %p1138_p0 = scmp.lt.s32.totalorder %s1136_s9, %s1129_s29 }
  0x35   : > { %p1133_p11 = pneg %p1132_p10 }
  0x36   : > { %p1139_p3 = por %p1138_p0, %p1137_p12 }
  0x38   : > { %p1140_p1 = pnand %p1139_p3, %p1133_p11 }
  0x3a   : > { %1143 = shalt.err (!%p1140_p1)
}
  0x3b   : > { %1000 = dma.hbm_to_vmem [thread:$0]  (!%p1836_p4), %s166_s6, 128, %s169_s17, %s158_s7  }
  0x3c   : > { %p174_p2 = pnand %p787_p5, %p173_p6 }
  0x3d   : > { %s179_s12 = sand.u32 (!%p174_p2), 1, %s1660_s25  }
  0x3e   : > { %177 = sbr.rel (%p174_p2) target bundleno = 869 (0x365), region = 32  ;;  %s1851_s24 = sshll.u32 (!%p174_p2), %s179_s12, 3 }
  0x3f   : > { %s180_s10 = scalar_lea.sflag (!%p174_p2), [#allocation7], %s179_s12 }
  0x43   : > { %1633 = dma.done.wait (%p1806_p8), %s180_s10, 128  }
  0x44   : > { %1635 = vsyncadd (%p1806_p8), %s180_s10, 4294967168  ;;  %s2469_s8 = sand.u32 1, %s1648_s22   ;;  %s790_s16 = sshll.u32 %s1672_s27, 4 }
  0x45   : > { %s1862_s6 = sshll.u32 %s2469_s8, 3  ;;  %s791_s17 = sshll.u32 %s1668_s0, 3 }
  0x46   : > { %s1865_s7 = sadd.s32 %s791_s17, %s790_s16  ;;  %p1006_p8 = scmp.eq.s32.totalorder %s1668_s0, 0 }
  0x47   : > { %s1688_s11 = smov [#allocation2]   ;;  %s243_s12 = sadd.s32 1, %s1865_s7 }
  0x48   : > { %s946_s14 = scalar_select %p1006_p8, [#allocation5], [#allocation44] }
  0x49   : > { %s947_s15 = scalar_select %p1006_p8, %s1865_s7, 0 }
  0x4a   : > { %s239_s9 = sshll.u32 %s1688_s11, 4  ;;  %s2541_s12 = smov (!%p1006_p8, %s243_s12), 0  ;;  %s1878_s9 = int_to_ptr.vmem [resolvable:$true] %s239_s9 }
  0x4b   : > { %s225_s10 = sld [smem:[%s946_s14 + %s947_s15]]  ;;  %s1689_s16 = smov [#allocation2 + $0x1]  }
  0x4c   : > { %s949_s8 = scalar_select %p1006_p8, [#allocation5], [#allocation45] }
  0x4d   : > { %s259_s17 = sshll.u32 %s1689_s16, 4  ;;  %s263_s2 = sadd.s32 2, %s1865_s7  ;;  %s1890_s17 = int_to_ptr.vmem [resolvable:$true] %s259_s17 }
  0x4e   : > { %s1880_s29 = sld [smem:[%s949_s8 + %s2541_s12]]  ;;  %s2543_s2 = smov (!%p1006_p8, %s263_s2), 0 }
  0x4f   : > { %s952_s28 = scalar_select %p1006_p8, [#allocation5], [#allocation46] }
  0x50   : > { %s1690_s16 = smov [#allocation2 + $0x2]  }
  0x51   : > { %p226_p2 = scmp.lt.s32.totalorder %s225_s10, 63  ;;  %p796_p4 = scmp.gt.s32.totalorder %s225_s10, 0 }
  0x52   : > { %s1887_s14 = sld [smem:[%s952_s28 + %s2543_s2]]  ;;  %s279_s13 = sshll.u32 %s1690_s16, 4  ;;  %s1928_s13 = int_to_ptr.vmem [resolvable:$true] %s279_s13 }
  0x53   : > { %s2545_s10 = smov (!%p226_p2, %s225_s10), 63  ;;  %s1901_s28 = scalar_lea.hbm %s2461_s1, 1024 }
  0x54   : > { %s2547_s10 = smov (!%p796_p4, %s2545_s10), 0  ;;  %p245_p5 = scmp.lt.s32.totalorder %s1880_s29, 63 }
  0x55   : > { %s801_s15 = sshll.u32 %s2547_s10, 4 }
  0x56   : > { %s231_s12 = scalar_lea.hbm %s2461_s1, %s801_s15 }
  0x57   : > { %s1144_s26 = scalar_lea.hbm %s231_s12, 16  ;;  %p1149_p11 = scmp.lt.s32.totalorder %s231_s12, %s2461_s1 }
  0x58   : > { %p1145_p7 = scmp.ne.s32.totalorder %s231_s12, %s1144_s26  ;;  %p1150_p12 = scmp.lt.s32.totalorder %s1901_s28, %s1144_s26 }
  0x5a   : > { %p1146_p9 = pnand %p1145_p7, %p1006_p8  ;;  %p1151_p0 = por %p1150_p12, %p1149_p11 }
  0x5c   : > { %p1147_p10 = pneg %p1146_p9 }
  0x5e   : > { %p1152_p3 = pnand %p1151_p0, %p1147_p10 }
  0x60   : > { %1155 = shalt.err (!%p1152_p3)  }
  0x61   : > { %s1156_s10 = scalar_lea.vmem %s1878_s9, 16  ;;  %s1912_s25 = scalar_lea.vmem %s1878_s9, 256 }
  0x62   : > { %p1157_p1 = scmp.ne.s32.totalorder %s1878_s9, %s1156_s10  ;;  %p1163_p7 = scmp.lt.s32.totalorder %s1878_s9, %s1878_s9 }
  0x63   : > { %p1164_p9 = scmp.lt.s32.totalorder %s1912_s25, %s1156_s10 }
  0x64   : > { %p1158_p2 = pnand %p1157_p1, %p1006_p8 }
  0x65   : > { %p1165_p6 = por %p1164_p9, %p1163_p7 }
  0x66   : > { %p1159_p4 = pneg %p1158_p2 }
  0x68   : > { %p1166_p11 = pnand %p1165_p6, %p1159_p4 }
  0x6a   : > { %1169 = shalt.err (!%p1166_p11)  }
  0x6b   : > { %948 = dma.hbm_to_vmem [thread:$0]  (%p1006_p8), %s231_s12, 16, %s1878_s9, [#allocation3] }
  0x6c   : > { %s246_s23 = scalar_select %p245_p5, %s1880_s29, 63 }
  0x6d   : > { %p265_p10 = scmp.lt.s32.totalorder %s1887_s14, 63  ;;  %p2502_p0 = scmp.gt.s32.totalorder %s1880_s29, 0 }
  0x6f   : > { %s2549_s23 = smov (!%p2502_p0, %s246_s23), 0 }
  0x70   : > { %s266_s26 = scalar_select %p265_p10, %s1887_s14, 63 }
  0x71   : > { %s807_s18 = sshll.u32 %s2549_s23, 4 }
  0x72   : > { %s250_s11 = scalar_lea.hbm %s2461_s1, %s807_s18 }
  0x73   : > { %s1170_s16 = scalar_lea.hbm %s250_s11, 16  ;;  %p1175_p5 = scmp.lt.s32.totalorder %s250_s11, %s2461_s1 }
  0x74   : > { %p1171_p6 = scmp.ne.s32.totalorder %s250_s11, %s1170_s16  ;;  %p1176_p2 = scmp.lt.s32.totalorder %s1901_s28, %s1170_s16 }
  0x76   : > { %p1172_p3 = pnand %p1171_p6, %p1006_p8  ;;  %p1177_p4 = por %p1176_p2, %p1175_p5 }
  0x78   : > { %p1173_p1 = pneg %p1172_p3 }
  0x7a   : > { %p1178_p7 = pnand %p1177_p4, %p1173_p1 }
  0x7c   : > { %1181 = shalt.err (!%p1178_p7)  }
  0x7d   : > { %s1182_s29 = scalar_lea.vmem %s1890_s17, 16  ;;  %p1189_p0 = scmp.lt.s32.totalorder %s1890_s17, %s1878_s9 }
  0x7e   : > { %p1183_p9 = scmp.ne.s32.totalorder %s1890_s17, %s1182_s29  ;;  %p1190_p6 = scmp.lt.s32.totalorder %s1912_s25, %s1182_s29 }
  0x80   : > { %p1184_p11 = pnand %p1183_p9, %p1006_p8  ;;  %p1191_p3 = por %p1190_p6, %p1189_p0 }
  0x82   : > { %p1185_p10 = pneg %p1184_p11 }
  0x84   : > { %p1192_p12 = pnand %p1191_p3, %p1185_p10 }
  0x86   : > { %1195 = shalt.err (!%p1192_p12)  }
  0x87   : > { %951 = dma.hbm_to_vmem [thread:$0]  (%p1006_p8), %s250_s11, 16, %s1890_s17, [#allocation3] }
  0x88   : > { %p2503_p1 = scmp.gt.s32.totalorder %s1887_s14, 0  ;;  %s283_s18 = sadd.s32 3, %s1865_s7 }
  0x89   : > { %s955_s10 = scalar_select %p1006_p8, [#allocation5], [#allocation47] }
  0x8a   : > { %s2551_s26 = smov (!%p2503_p1, %s266_s26), 0  ;;  %s1691_s12 = smov [#allocation2 + $0x3]  }
  0x8b   : > { %s813_s23 = sshll.u32 %s2551_s26, 4  ;;  %s299_s2 = sshll.u32 %s1691_s12, 4  ;;  %s1975_s2 = int_to_ptr.vmem [resolvable:$true] %s299_s2 }
  0x8c   : > { %s270_s16 = scalar_lea.hbm %s2461_s1, %s813_s23 }
  0x8d   : > { %s1196_s29 = scalar_lea.hbm %s270_s16, 16  ;;  %p1201_p4 = scmp.lt.s32.totalorder %s270_s16, %s2461_s1 }
  0x8e   : > { %p1197_p12 = scmp.ne.s32.totalorder %s270_s16, %s1196_s29  ;;  %p1202_p7 = scmp.lt.s32.totalorder %s1901_s28, %s1196_s29 }
  0x90   : > { %p1198_p5 = pnand %p1197_p12, %p1006_p8  ;;  %p1203_p9 = por %p1202_p7, %p1201_p4 }
  0x92   : > { %p1199_p2 = pneg %p1198_p5 }
  0x94   : > { %p1204_p11 = pnand %p1203_p9, %p1199_p2 }
  0x96   : > { %1207 = shalt.err (!%p1204_p11)  }
  0x97   : > { %s1208_s17 = scalar_lea.vmem %s1928_s13, 16  ;;  %p1215_p3 = scmp.lt.s32.totalorder %s1928_s13, %s1878_s9 }
  0x98   : > { %p1209_p10 = scmp.ne.s32.totalorder %s1928_s13, %s1208_s17  ;;  %p1216_p1 = scmp.lt.s32.totalorder %s1912_s25, %s1208_s17 }
  0x9a   : > { %p1210_p0 = pnand %p1209_p10, %p1006_p8  ;;  %p1217_p12 = por %p1216_p1, %p1215_p3 }
  0x9c   : > { %p1211_p6 = pneg %p1210_p0 }
  0x9e   : > { %p1218_p5 = pnand %p1217_p12, %p1211_p6 }
  0xa0   : > { %1221 = shalt.err (!%p1218_p5)  }
  0xa1   : > { %954 = dma.hbm_to_vmem [thread:$0]  (%p1006_p8), %s270_s16, 16, %s1928_s13, [#allocation3] }
  0xa2   : > { %s2553_s18 = smov (!%p1006_p8, %s283_s18), 0  ;;  %s303_s21 = sadd.s32 4, %s1865_s7 }
  0xa3   : > { %s284_s20 = sld [smem:[%s955_s10 + %s2553_s18]]  ;;  %s2555_s21 = smov (!%p1006_p8, %s303_s21), 0 }
  0xa4   : > { %s958_s14 = scalar_select %p1006_p8, [#allocation5], [#allocation48] }
  0xa5   : > { %s1692_s26 = smov [#allocation2 + $0x4]   ;;  %s323_s23 = sadd.s32 5, %s1865_s7 }
  0xa6   : > { %s319_s11 = sshll.u32 %s1692_s26, 4  ;;  %s1983_s15 = sld [smem:[%s958_s14 + %s2555_s21]]  ;;  %s1992_s11 = int_to_ptr.vmem [resolvable:$true] %s319_s11 }
  0xa7   : > { %s961_s8 = scalar_select %p1006_p8, [#allocation5], [#allocation49] }
  0xa8   : > { %s2557_s23 = smov (!%p1006_p8, %s323_s23), 0  ;;  %s1693_s10 = smov [#allocation2 + $0x5]  }
  0xa9   : > { %p285_p2 = scmp.lt.s32.totalorder %s284_s20, 63  ;;  %p814_p4 = scmp.gt.s32.totalorder %s284_s20, 0 }
  0xaa   : > { %s1989_s13 = sld [smem:[%s961_s8 + %s2557_s23]]  ;;  %s339_s18 = sshll.u32 %s1693_s10, 4  ;;  %s1998_s18 = int_to_ptr.vmem [resolvable:$true] %s339_s18 }
  0xab   : > { %s2559_s20 = smov (!%p285_p2, %s284_s20), 63 }
  0xac   : > { %s2561_s20 = smov (!%p814_p4, %s2559_s20), 0 }
  0xad   : > { %s819_s16 = sshll.u32 %s2561_s20, 4 }
  0xae   : > { %s290_s17 = scalar_lea.hbm %s2461_s1, %s819_s16 }
  0xaf   : > { %s1222_s21 = scalar_lea.hbm %s290_s17, 16  ;;  %p1227_p6 = scmp.lt.s32.totalorder %s290_s17, %s2461_s1 }
  0xb0   : > { %p1223_p11 = scmp.ne.s32.totalorder %s290_s17, %s1222_s21  ;;  %p1228_p3 = scmp.lt.s32.totalorder %s1901_s28, %s1222_s21 }
  0xb2   : > { %p1224_p10 = pnand %p1223_p11, %p1006_p8  ;;  %p1229_p1 = por %p1228_p3, %p1227_p6 }
  0xb4   : > { %p1225_p0 = pneg %p1224_p10 }
  0xb6   : > { %p1230_p12 = pnand %p1229_p1, %p1225_p0 }
  0xb8   : > { %1233 = shalt.err (!%p1230_p12)  }
  0xb9   : > { %s1234_s20 = scalar_lea.vmem %s1975_s2, 16  ;;  %p1241_p11 = scmp.lt.s32.totalorder %s1975_s2, %s1878_s9 }
  0xba   : > { %p1235_p5 = scmp.ne.s32.totalorder %s1975_s2, %s1234_s20  ;;  %p1242_p10 = scmp.lt.s32.totalorder %s1912_s25, %s1234_s20 }
  0xbc   : > { %p1236_p2 = pnand %p1235_p5, %p1006_p8  ;;  %p1243_p9 = por %p1242_p10, %p1241_p11 }
  0xbe   : > { %p1237_p4 = pneg %p1236_p2 }
  0xc0   : > { %p1244_p7 = pnand %p1243_p9, %p1237_p4 }
  0xc2   : > { %1247 = shalt.err (!%p1244_p7)  }
  0xc3   : > { %957 = dma.hbm_to_vmem [thread:$0]  (%p1006_p8), %s290_s17, 16, %s1975_s2, [#allocation3] }
  0xc4   : > { %p2504_p0 = scmp.lt.s32.totalorder %s1983_s15, 63  ;;  %p325_p6 = scmp.lt.s32.totalorder %s1989_s13, 63 }
  0xc5   : > { %p2505_p1 = scmp.gt.s32.totalorder %s1983_s15, 0 }
  0xc6   : > { %s306_s23 = scalar_select %p2504_p0, %s1983_s15, 63 }
  0xc7   : > { %s326_s8 = scalar_select %p325_p6, %s1989_s13, 63 }
  0xc8   : > { %s2563_s23 = smov (!%p2505_p1, %s306_s23), 0 }
  0xc9   : > { %s825_s10 = sshll.u32 %s2563_s23, 4 }
  0xca   : > { %s310_s21 = scalar_lea.hbm %s2461_s1, %s825_s10 }
  0xcb   : > { %s1248_s14 = scalar_lea.hbm %s310_s21, 16  ;;  %p1253_p5 = scmp.lt.s32.totalorder %s310_s21, %s2461_s1 }
  0xcc   : > { %p1249_p7 = scmp.ne.s32.totalorder %s310_s21, %s1248_s14  ;;  %p1254_p2 = scmp.lt.s32.totalorder %s1901_s28, %s1248_s14 }
  0xce   : > { %p1250_p9 = pnand %p1249_p7, %p1006_p8  ;;  %p1255_p4 = por %p1254_p2, %p1253_p5 }
  0xd0   : > { %p1251_p12 = pneg %p1250_p9 }
  0xd2   : > { %p1256_p11 = pnand %p1255_p4, %p1251_p12 }
  0xd4   : > { %1259 = shalt.err (!%p1256_p11)  }
  0xd5   : > { %s1260_s15 = scalar_lea.vmem %s1992_s11, 16  ;;  %p1267_p1 = scmp.lt.s32.totalorder %s1992_s11, %s1878_s9 }
  0xd6   : > { %p1261_p10 = scmp.ne.s32.totalorder %s1992_s11, %s1260_s15  ;;  %p1268_p7 = scmp.lt.s32.totalorder %s1912_s25, %s1260_s15 }
  0xd8   : > { %p1262_p0 = pnand %p1261_p10, %p1006_p8  ;;  %p1269_p9 = por %p1268_p7, %p1267_p1 }
  0xda   : > { %p1263_p6 = pneg %p1262_p0 }
  0xdc   : > { %p1270_p3 = pnand %p1269_p9, %p1263_p6 }
  0xde   : > { %1273 = shalt.err (!%p1270_p3)  }
  0xdf   : > { %960 = dma.hbm_to_vmem [thread:$0]  (%p1006_p8), %s310_s21, 16, %s1992_s11, [#allocation3] }
  0xe0   : > { %p2506_p12 = scmp.gt.s32.totalorder %s1989_s13, 0  ;;  %s1694_s23 = smov [#allocation2 + $0x6]  }
  0xe1   : > { %s964_s17 = scalar_select %p1006_p8, [#allocation5], [#allocation50] }
  0xe2   : > { %s2565_s8 = smov (!%p2506_p12, %s326_s8), 0  ;;  %s359_s10 = sshll.u32 %s1694_s23, 4  ;;  %s2076_s10 = int_to_ptr.vmem [resolvable:$true] %s359_s10 }
  0xe3   : > { %s831_s20 = sshll.u32 %s2565_s8, 4  ;;  %s363_s26 = sadd.s32 7, %s1865_s7 }
  0xe4   : > { %s330_s14 = scalar_lea.hbm %s2461_s1, %s831_s20 }
  0xe5   : > { %s1274_s2 = scalar_lea.hbm %s330_s14, 16  ;;  %p1279_p4 = scmp.lt.s32.totalorder %s330_s14, %s2461_s1 }
  0xe6   : > { %p1275_p3 = scmp.ne.s32.totalorder %s330_s14, %s1274_s2  ;;  %p1280_p11 = scmp.lt.s32.totalorder %s1901_s28, %s1274_s2 }
  0xe8   : > { %p1276_p5 = pnand %p1275_p3, %p1006_p8  ;;  %p1281_p10 = por %p1280_p11, %p1279_p4 }
  0xea   : > { %p1277_p2 = pneg %p1276_p5 }
  0xec   : > { %p1282_p0 = pnand %p1281_p10, %p1277_p2 }
  0xee   : > { %1285 = shalt.err (!%p1282_p0)  }
  0xef   : > { %s1286_s11 = scalar_lea.vmem %s1998_s18, 16  ;;  %p1293_p9 = scmp.lt.s32.totalorder %s1998_s18, %s1878_s9 }
  0xf0   : > { %p1287_p6 = scmp.ne.s32.totalorder %s1998_s18, %s1286_s11  ;;  %p1294_p12 = scmp.lt.s32.totalorder %s1912_s25, %s1286_s11 }
  0xf2   : > { %p1288_p1 = pnand %p1287_p6, %p1006_p8  ;;  %p1295_p3 = por %p1294_p12, %p1293_p9 }
  0xf4   : > { %p1289_p7 = pneg %p1288_p1 }
  0xf6   : > { %p1296_p5 = pnand %p1295_p3, %p1289_p7 }
  0xf8   : > { %1299 = shalt.err (!%p1296_p5)  }
  0xf9   : > { %963 = dma.hbm_to_vmem [thread:$0]  (%p1006_p8), %s330_s14, 16, %s1998_s18, [#allocation3] }
  0xfa   : > { %s2507_s13 = sadd.s32 6, %s1865_s7  ;;  %s2569_s26 = smov (!%p1006_p8, %s363_s26), 0 }
  0xfb   : > { %s2567_s13 = smov (!%p1006_p8, %s2507_s13), 0  ;;  %s1695_s20 = smov [#allocation2 + $0x7]  }
  0xfc   : > { %s967_s8 = scalar_select %p1006_p8, [#allocation5], [#allocation51] }
  0xfd   : > { %s344_s16 = sld [smem:[%s964_s17 + %s2567_s13]]  ;;  %s379_s23 = sshll.u32 %s1695_s20, 4  ;;  %s2090_s23 = int_to_ptr.vmem [resolvable:$true] %s379_s23 }
  0xfe   : > { %s2078_s21 = sld [smem:[%s967_s8 + %s2569_s26]]  ;;  %s210_s12 = ssub.s32 0, %s1668_s0 }
  0xff   : > { %s383_s29 = sadd.s32 1, %s1668_s0  ;;  %s2083_s18 = smin.u32 %s1668_s0, %s210_s12 }
 0x100   : > { %s212_s17 = sand.u32 1, %s2083_s18  }
 0x101   : > { %s213_s13 = ssub.s32 0, %s212_s17 }
 0x103   : > { %p345_p2 = scmp.lt.s32.totalorder %s344_s16, 63  ;;  %p832_p4 = scmp.gt.s32.totalorder %s344_s16, 0 }
 0x104   : > { %p365_p10 = scmp.lt.s32.totalorder %s2078_s21, 63 }
 0x105   : > { %s2571_s16 = smov (!%p345_p2, %s344_s16), 63 }
 0x106   : > { %s2573_s16 = smov (!%p832_p4, %s2571_s16), 0 }
 0x107   : > { %s366_s14 = scalar_select %p365_p10, %s2078_s21, 63 }
 0x108   : > { %s837_s26 = sshll.u32 %s2573_s16, 4 }
 0x109   : > { %s350_s11 = scalar_lea.hbm %s2461_s1, %s837_s26 }
 0x10a   : > { %s1300_s8 = scalar_lea.hbm %s350_s11, 16  ;;  %p1305_p9 = scmp.lt.s32.totalorder %s350_s11, %s2461_s1 }
 0x10b   : > { %p1301_p6 = scmp.ne.s32.totalorder %s350_s11, %s1300_s8  ;;  %p1306_p12 = scmp.lt.s32.totalorder %s1901_s28, %s1300_s8 }
 0x10d   : > { %p1302_p1 = pnand %p1301_p6, %p1006_p8  ;;  %p1307_p3 = por %p1306_p12, %p1305_p9 }
 0x10f   : > { %p1303_p7 = pneg %p1302_p1 }
 0x111   : > { %p1308_p5 = pnand %p1307_p3, %p1303_p7 }
 0x113   : > { %1311 = shalt.err (!%p1308_p5)  }
 0x114   : > { %s1312_s16 = scalar_lea.vmem %s2076_s10, 16  ;;  %p1319_p6 = scmp.lt.s32.totalorder %s2076_s10, %s1878_s9 }
 0x115   : > { %p1313_p2 = scmp.ne.s32.totalorder %s2076_s10, %s1312_s16  ;;  %p1320_p1 = scmp.lt.s32.totalorder %s1912_s25, %s1312_s16 }
 0x117   : > { %p1314_p4 = pnand %p1313_p2, %p1006_p8  ;;  %p1321_p11 = por %p1320_p1, %p1319_p6 }
 0x119   : > { %p1315_p10 = pneg %p1314_p4 }
 0x11b   : > { %p1322_p0 = pnand %p1321_p11, %p1315_p10 }
 0x11d   : > { %1325 = shalt.err (!%p1322_p0)  }
 0x11e   : > { %966 = dma.hbm_to_vmem [thread:$0]  (%p1006_p8), %s350_s11, 16, %s2076_s10, [#allocation3] }
 0x11f   : > { %p2508_p7 = scmp.gt.s32.totalorder %s2078_s21, 0  ;;  %p2509_p9 = scmp.lt.s32.totalorder %s1668_s0, 0 }
 0x120   : > { %p2121_p12 = scmp.lt.s32.totalorder %s383_s29, 2 }
 0x121   : > { %s2575_s14 = smov (!%p2508_p7, %s366_s14), 0  ;;  %s2577_s13 = smov (!%p2509_p9, %s213_s13), %s212_s17 }
 0x122   : > { %s843_s26 = sshll.u32 %s2575_s14, 4 }
 0x123   : > { %s370_s20 = scalar_lea.hbm %s2461_s1, %s843_s26 }
 0x124   : > { %s1326_s12 = scalar_lea.hbm %s370_s20, 16  ;;  %p1331_p2 = scmp.lt.s32.totalorder %s370_s20, %s2461_s1 }
 0x125   : > { %p1327_p0 = scmp.ne.s32.totalorder %s370_s20, %s1326_s12  ;;  %p1332_p4 = scmp.lt.s32.totalorder %s1901_s28, %s1326_s12 }
 0x127   : > { %p1328_p3 = pnand %p1327_p0, %p1006_p8  ;;  %p1333_p10 = por %p1332_p4, %p1331_p2 }
 0x129   : > { %p1329_p5 = pneg %p1328_p3 }
 0x12b   : > { %p1334_p6 = pnand %p1333_p10, %p1329_p5 }
 0x12d   : > { %1337 = shalt.err (!%p1334_p6)  }
 0x12e   : > { %s1338_s29 = scalar_lea.vmem %s2090_s23, 16  ;;  %p1345_p0 = scmp.lt.s32.totalorder %s2090_s23, %s1878_s9 }
 0x12f   : > { %p1339_p1 = scmp.ne.s32.totalorder %s2090_s23, %s1338_s29  ;;  %p1346_p3 = scmp.lt.s32.totalorder %s1912_s25, %s1338_s29 }
 0x131   : > { %p1340_p7 = pnand %p1339_p1, %p1006_p8  ;;  %p1347_p11 = por %p1346_p3, %p1345_p0 }
 0x133   : > { %p1341_p9 = pneg %p1340_p7 }
 0x135   : > { %p1348_p13 = pnand %p1347_p11, %p1341_p9 }
 0x137   : > { %1351 = shalt.err (!%p1348_p13)  }
 0x138   : > { %969 = dma.hbm_to_vmem [thread:$0]  (%p1006_p8), %s370_s20, 16, %s2090_s23, [#allocation3] }
 0x139   : > { %s219_s18 = sadd.s32 2, %s2577_s13  ;;  %s389_s17 = sadd.s32 8, %s1865_s7 }
 0x13a   : > { %p2511_p5 = scmp.lt.s32.totalorder %s2577_s13, 0  ;;  %s2581_s17 = smov (!%p2121_p12, %s389_s17), 0 }
 0x13b   : > { %s971_s14 = scalar_select %p2121_p12, [#allocation5], [#allocation52] }
 0x13c   : > { %s2579_s18 = smov (!%p2511_p5, %s219_s18), %s2577_s13  ;;  %s411_s26 = sadd.s32 9, %s1865_s7 }
 0x13d   : > { %s388_s11 = ssub.s32 1, %s2579_s18  ;;  %s390_s15 = sld [smem:[%s971_s14 + %s2581_s17]] }
 0x13e   : > { %s851_s16 = sshll.u32 %s388_s11, 3  ;;  %s432_s8 = sadd.s32 10, %s1865_s7 }
 0x13f   : > { %s2155_s12 = scalar_lea.vmem [#allocation2], %s851_s16  ;;  %s2583_s26 = smov (!%p2121_p12, %s411_s26), 0 }
 0x140   : > { %s407_s23 = sshll.u32 %s2155_s12, 4  ;;  %s702_s13 = scalar_lea.vmem %s2155_s12, 1 [#allocation2]  ;;  %s2163_s23 = int_to_ptr.vmem [resolvable:$true] %s407_s23 }
 0x141   : > { %s974_s20 = scalar_select %p2121_p12, [#allocation5], [#allocation53] }
 0x142   : > { %s2165_s10 = sshll.u32 %s702_s13, 4  ;;  %s707_s29 = scalar_lea.vmem %s2155_s12, 2 [#allocation2]  ;;  %s429_s10 = int_to_ptr.vmem [resolvable:$true] %s2165_s10 }
 0x143   : > { %p391_p13 = scmp.lt.s32.totalorder %s390_s15, 63  ;;  %p845_p8 = scmp.gt.s32.totalorder %s390_s15, 0 }
 0x144   : > { %s2167_s21 = sld [smem:[%s974_s20 + %s2583_s26]]  ;;  %s2589_s8 = smov (!%p2121_p12, %s432_s8), 0 }
 0x145   : > { %s2585_s15 = smov (!%p391_p13, %s390_s15), 63  ;;  %s449_s16 = sshll.u32 %s707_s29, 4  ;;  %s2207_s16 = int_to_ptr.vmem [resolvable:$true] %s449_s16 }
 0x146   : > { %s977_s17 = scalar_select %p2121_p12, [#allocation5], [#allocation54] }
 0x147   : > { %s2587_s15 = smov (!%p845_p8, %s2585_s15), 0  ;;  %s2178_s4 = scalar_lea.sflag [#allocation3], %s388_s11 }
 0x148   : > { %s850_s14 = sshll.u32 %s2587_s15, 4 }
 0x149   : > { %s396_s13 = scalar_lea.hbm %s2461_s1, %s850_s14 }
 0x14a   : > { %p413_p11 = scmp.lt.s32.totalorder %s2167_s21, 63  ;;  %s1352_s26 = scalar_lea.hbm %s396_s13, 16 }
 0x14b   : > { %p1353_p2 = scmp.ne.s32.totalorder %s396_s13, %s1352_s26  ;;  %p1357_p6 = scmp.lt.s32.totalorder %s396_s13, %s2461_s1 }
 0x14c   : > { %p1358_p1 = scmp.lt.s32.totalorder %s1901_s28, %s1352_s26 }
 0x14d   : > { %p1354_p4 = pnand %p1353_p2, %p2121_p12 }
 0x14e   : > { %p1359_p7 = por %p1358_p1, %p1357_p6 }
 0x14f   : > { %p1355_p10 = pneg %p1354_p4 }
 0x151   : > { %p1360_p9 = pnand %p1359_p7, %p1355_p10 }
 0x153   : > { %1363 = shalt.err (!%p1360_p9)  }
 0x154   : > { %s1364_s5 = scalar_lea.vmem %s2163_s23, 16  ;;  %p1371_p13 = scmp.lt.s32.totalorder %s2163_s23, %s1878_s9 }
 0x155   : > { %p1365_p0 = scmp.ne.s32.totalorder %s2163_s23, %s1364_s5  ;;  %p1372_p8 = scmp.lt.s32.totalorder %s1912_s25, %s1364_s5 }
 0x157   : > { %p1366_p3 = pnand %p1365_p0, %p2121_p12  ;;  %p1373_p2 = por %p1372_p8, %p1371_p13 }
 0x159   : > { %p1367_p5 = pneg %p1366_p3 }
 0x15b   : > { %p1374_p4 = pnand %p1373_p2, %p1367_p5 }
 0x15d   : > { %1377 = shalt.err (!%p1374_p4)  }
 0x15e   : > { %973 = dma.hbm_to_vmem [thread:$0]  (%p2121_p12), %s396_s13, 16, %s2163_s23, %s2178_s4 }
 0x15f   : > { %s414_s3 = scalar_select %p413_p11, %s2167_s21, 63 }
 0x160   : > { %p852_p10 = scmp.gt.s32.totalorder %s2167_s21, 0  ;;  %s2204_s30 = sld [smem:[%s977_s17 + %s2589_s8]] }
 0x161   : > { %s980_s11 = scalar_select %p2121_p12, [#allocation5], [#allocation55] }
 0x162   : > { %s2591_s3 = smov (!%p852_p10, %s414_s3), 0  ;;  %s453_s29 = sadd.s32 11, %s1865_s7 }
 0x163   : > { %s857_s15 = sshll.u32 %s2591_s3, 4  ;;  %s712_s13 = scalar_lea.vmem %s2155_s12, 3 [#allocation2] }
 0x164   : > { %s418_s23 = scalar_lea.hbm %s2461_s1, %s857_s15 }
 0x165   : > { %s1378_s20 = scalar_lea.hbm %s418_s23, 16  ;;  %p1383_p7 = scmp.lt.s32.totalorder %s418_s23, %s2461_s1 }
 0x166   : > { %p1379_p11 = scmp.ne.s32.totalorder %s418_s23, %s1378_s20  ;;  %p1384_p9 = scmp.lt.s32.totalorder %s1901_s28, %s1378_s20 }
 0x168   : > { %p1380_p6 = pnand %p1379_p11, %p2121_p12  ;;  %p1385_p0 = por %p1384_p9, %p1383_p7 }
 0x16a   : > { %p1381_p1 = pneg %p1380_p6 }
 0x16c   : > { %p1386_p3 = pnand %p1385_p0, %p1381_p1 }
 0x16e   : > { %1389 = shalt.err (!%p1386_p3)  }
 0x16f   : > { %s1390_s17 = scalar_lea.vmem %s429_s10, 16  ;;  %p1397_p2 = scmp.lt.s32.totalorder %s429_s10, %s1878_s9 }
 0x170   : > { %p1391_p5 = scmp.ne.s32.totalorder %s429_s10, %s1390_s17  ;;  %p1398_p4 = scmp.lt.s32.totalorder %s1912_s25, %s1390_s17 }
 0x172   : > { %p1392_p13 = pnand %p1391_p5, %p2121_p12  ;;  %p1399_p10 = por %p1398_p4, %p1397_p2 }
 0x174   : > { %p1393_p8 = pneg %p1392_p13 }
 0x176   : > { %p1400_p11 = pnand %p1399_p10, %p1393_p8 }
 0x178   : > { %1403 = shalt.err (!%p1400_p11)  }
 0x179   : > { %976 = dma.hbm_to_vmem [thread:$0]  (%p2121_p12), %s418_s23, 16, %s429_s10, %s2178_s4 }
 0x17a   : > { %p434_p6 = scmp.lt.s32.totalorder %s2204_s30, 63  ;;  %p859_p1 = scmp.gt.s32.totalorder %s2204_s30, 0 }
 0x17b   : > { %s2593_s29 = smov (!%p2121_p12, %s453_s29), 0  ;;  %s2236_s3 = sshll.u32 %s712_s13, 4  ;;  %s471_s3 = int_to_ptr.vmem [resolvable:$true] %s2236_s3 }
 0x17c   : > { %s2595_s30 = smov (!%p434_p6, %s2204_s30), 63  ;;  %s2234_s5 = sld [smem:[%s980_s11 + %s2593_s29]] }
 0x17d   : > { %s2597_s30 = smov (!%p859_p1, %s2595_s30), 0  ;;  %s474_s26 = sadd.s32 12, %s1865_s7 }
 0x17e   : > { %s983_s15 = scalar_select %p2121_p12, [#allocation5], [#allocation56] }
 0x17f   : > { %s864_s14 = sshll.u32 %s2597_s30, 4  ;;  %s717_s10 = scalar_lea.vmem %s2155_s12, 4 [#allocation2] }
 0x180   : > { %s439_s21 = scalar_lea.hbm %s2461_s1, %s864_s14 }
 0x181   : > { %s1404_s23 = scalar_lea.hbm %s439_s21, 16  ;;  %p1409_p3 = scmp.lt.s32.totalorder %s439_s21, %s2461_s1 }
 0x182   : > { %p1405_p7 = scmp.ne.s32.totalorder %s439_s21, %s1404_s23  ;;  %p1410_p5 = scmp.lt.s32.totalorder %s1901_s28, %s1404_s23 }
 0x184   : > { %p1406_p9 = pnand %p1405_p7, %p2121_p12  ;;  %p1411_p13 = por %p1410_p5, %p1409_p3 }
 0x186   : > { %p1407_p0 = pneg %p1406_p9 }
 0x188   : > { %p1412_p8 = pnand %p1411_p13, %p1407_p0 }
 0x18a   : > { %1415 = shalt.err (!%p1412_p8)  }
 0x18b   : > { %s1416_s30 = scalar_lea.vmem %s2207_s16, 16  ;;  %p1423_p11 = scmp.lt.s32.totalorder %s2207_s16, %s1878_s9 }
 0x18c   : > { %p1417_p2 = scmp.ne.s32.totalorder %s2207_s16, %s1416_s30  ;;  %p1424_p6 = scmp.lt.s32.totalorder %s1912_s25, %s1416_s30 }
 0x18e   : > { %p1418_p4 = pnand %p1417_p2, %p2121_p12  ;;  %p1425_p1 = por %p1424_p6, %p1423_p11 }
 0x190   : > { %p1419_p10 = pneg %p1418_p4 }
 0x192   : > { %p1426_p7 = pnand %p1425_p1, %p1419_p10 }
 0x194   : > { %1429 = shalt.err (!%p1426_p7)  }
 0x195   : > { %979 = dma.hbm_to_vmem [thread:$0]  (%p2121_p12), %s439_s21, 16, %s2207_s16, %s2178_s4 }
 0x196   : > { %p455_p9 = scmp.lt.s32.totalorder %s2234_s5, 63  ;;  %p866_p0 = scmp.gt.s32.totalorder %s2234_s5, 0 }
 0x197   : > { %s2599_s26 = smov (!%p2121_p12, %s474_s26), 0  ;;  %s2270_s13 = sshll.u32 %s717_s10, 4  ;;  %s492_s13 = int_to_ptr.vmem [resolvable:$true] %s2270_s13 }
 0x198   : > { %s2601_s5 = smov (!%p455_p9, %s2234_s5), 63  ;;  %s2267_s29 = sld [smem:[%s983_s15 + %s2599_s26]] }
 0x199   : > { %s2603_s5 = smov (!%p866_p0, %s2601_s5), 0  ;;  %s495_s20 = sadd.s32 13, %s1865_s7 }
 0x19a   : > { %s871_s14 = sshll.u32 %s2603_s5, 4  ;;  %s722_s11 = scalar_lea.vmem %s2155_s12, 5 [#allocation2] }
 0x19b   : > { %s460_s17 = scalar_lea.hbm %s2461_s1, %s871_s14 }
 0x19c   : > { %s1430_s16 = scalar_lea.hbm %s460_s17, 16  ;;  %p1435_p8 = scmp.lt.s32.totalorder %s460_s17, %s2461_s1 }
 0x19d   : > { %p1431_p3 = scmp.ne.s32.totalorder %s460_s17, %s1430_s16  ;;  %p1436_p2 = scmp.lt.s32.totalorder %s1901_s28, %s1430_s16 }
 0x19f   : > { %p1432_p5 = pnand %p1431_p3, %p2121_p12  ;;  %p1437_p4 = por %p1436_p2, %p1435_p8 }
 0x1a1   : > { %p1433_p13 = pneg %p1432_p5 }
 0x1a3   : > { %p1438_p10 = pnand %p1437_p4, %p1433_p13 }
 0x1a5   : > { %1441 = shalt.err (!%p1438_p10)  }
 0x1a6   : > { %s1442_s5 = scalar_lea.vmem %s471_s3, 16  ;;  %p1449_p7 = scmp.lt.s32.totalorder %s471_s3, %s1878_s9 }
 0x1a7   : > { %p1443_p11 = scmp.ne.s32.totalorder %s471_s3, %s1442_s5  ;;  %p1450_p9 = scmp.lt.s32.totalorder %s1912_s25, %s1442_s5 }
 0x1a9   : > { %p1444_p6 = pnand %p1443_p11, %p2121_p12  ;;  %p1451_p0 = por %p1450_p9, %p1449_p7 }
 0x1ab   : > { %p1445_p1 = pneg %p1444_p6 }
 0x1ad   : > { %p1452_p3 = pnand %p1451_p0, %p1445_p1 }
 0x1af   : > { %1455 = shalt.err (!%p1452_p3)  }
 0x1b0   : > { %982 = dma.hbm_to_vmem [thread:$0]  (%p2121_p12), %s460_s17, 16, %s471_s3, %s2178_s4 }
 0x1b1   : > { %p476_p5 = scmp.lt.s32.totalorder %s2267_s29, 63  ;;  %p873_p13 = scmp.gt.s32.totalorder %s2267_s29, 0 }
 0x1b2   : > { %s986_s15 = scalar_select %p2121_p12, [#allocation5], [#allocation57] }
 0x1b3   : > { %s2605_s29 = smov (!%p476_p5, %s2267_s29), 63  ;;  %s2607_s20 = smov (!%p2121_p12, %s495_s20), 0 }
 0x1b4   : > { %s2609_s29 = smov (!%p873_p13, %s2605_s29), 0  ;;  %s2298_s26 = sld [smem:[%s986_s15 + %s2607_s20]] }
 0x1b5   : > { %s878_s10 = sshll.u32 %s2609_s29, 4  ;;  %s512_s14 = sshll.u32 %s722_s11, 4  ;;  %s513_s14 = int_to_ptr.vmem [resolvable:$true] %s512_s14 }
 0x1b6   : > { %s481_s16 = scalar_lea.hbm %s2461_s1, %s878_s10  ;;  %s516_s21 = sadd.s32 14, %s1865_s7 }
 0x1b7   : > { %s1456_s3 = scalar_lea.hbm %s481_s16, 16  ;;  %p1461_p10 = scmp.lt.s32.totalorder %s481_s16, %s2461_s1 }
 0x1b8   : > { %p1457_p8 = scmp.ne.s32.totalorder %s481_s16, %s1456_s3  ;;  %p1462_p11 = scmp.lt.s32.totalorder %s1901_s28, %s1456_s3 }
 0x1ba   : > { %p1458_p2 = pnand %p1457_p8, %p2121_p12  ;;  %p1463_p6 = por %p1462_p11, %p1461_p10 }
 0x1bc   : > { %p1459_p4 = pneg %p1458_p2 }
 0x1be   : > { %p1464_p1 = pnand %p1463_p6, %p1459_p4 }
 0x1c0   : > { %1467 = shalt.err (!%p1464_p1)  }
 0x1c1   : > { %s1468_s29 = scalar_lea.vmem %s492_s13, 16  ;;  %p1475_p3 = scmp.lt.s32.totalorder %s492_s13, %s1878_s9 }
 0x1c2   : > { %p1469_p7 = scmp.ne.s32.totalorder %s492_s13, %s1468_s29  ;;  %p1476_p5 = scmp.lt.s32.totalorder %s1912_s25, %s1468_s29 }
 0x1c4   : > { %p1470_p9 = pnand %p1469_p7, %p2121_p12  ;;  %p1477_p13 = por %p1476_p5, %p1475_p3 }
 0x1c6   : > { %p1471_p0 = pneg %p1470_p9 }
 0x1c8   : > { %p1478_p8 = pnand %p1477_p13, %p1471_p0 }
 0x1ca   : > { %1481 = shalt.err (!%p1478_p8)  }
 0x1cb   : > { %985 = dma.hbm_to_vmem [thread:$0]  (%p2121_p12), %s481_s16, 16, %s492_s13, %s2178_s4 }
 0x1cc   : > { %s989_s20 = scalar_select %p2121_p12, [#allocation5], [#allocation58] }
 0x1cd   : > { %s2611_s21 = smov (!%p2121_p12, %s516_s21), 0  ;;  %p497_p2 = scmp.lt.s32.totalorder %s2298_s26, 63 }
 0x1ce   : > { %p880_p4 = scmp.gt.s32.totalorder %s2298_s26, 0  ;;  %s2323_s11 = sld [smem:[%s989_s20 + %s2611_s21]] }
 0x1cf   : > { %s2613_s26 = smov (!%p497_p2, %s2298_s26), 63  ;;  %s727_s5 = scalar_lea.vmem %s2155_s12, 6 [#allocation2] }
 0x1d0   : > { %s2615_s26 = smov (!%p880_p4, %s2613_s26), 0  ;;  %s537_s8 = sadd.s32 15, %s1865_s7 }
 0x1d1   : > { %s992_s15 = scalar_select %p2121_p12, [#allocation5], [#allocation59] }
 0x1d2   : > { %s885_s10 = sshll.u32 %s2615_s26, 4 }
 0x1d3   : > { %s502_s16 = scalar_lea.hbm %s2461_s1, %s885_s10 }
 0x1d4   : > { %p518_p10 = scmp.lt.s32.totalorder %s2323_s11, 63  ;;  %s1482_s3 = scalar_lea.hbm %s502_s16, 16 }
 0x1d5   : > { %p1483_p11 = scmp.ne.s32.totalorder %s502_s16, %s1482_s3  ;;  %p1487_p7 = scmp.lt.s32.totalorder %s502_s16, %s2461_s1 }
 0x1d6   : > { %p1488_p9 = scmp.lt.s32.totalorder %s1901_s28, %s1482_s3 }
 0x1d7   : > { %p1484_p6 = pnand %p1483_p11, %p2121_p12 }
 0x1d8   : > { %p1489_p0 = por %p1488_p9, %p1487_p7 }
 0x1d9   : > { %p1485_p1 = pneg %p1484_p6 }
 0x1db   : > { %p1490_p3 = pnand %p1489_p0, %p1485_p1 }
 0x1dd   : > { %1493 = shalt.err (!%p1490_p3)  }
 0x1de   : > { %s1494_s26 = scalar_lea.vmem %s513_s14, 16  ;;  %p1501_p2 = scmp.lt.s32.totalorder %s513_s14, %s1878_s9 }
 0x1df   : > { %p1495_p5 = scmp.ne.s32.totalorder %s513_s14, %s1494_s26  ;;  %p1502_p4 = scmp.lt.s32.totalorder %s1912_s25, %s1494_s26 }
 0x1e1   : > { %p1496_p13 = pnand %p1495_p5, %p2121_p12  ;;  %p1503_p11 = por %p1502_p4, %p1501_p2 }
 0x1e3   : > { %p1497_p8 = pneg %p1496_p13 }
 0x1e5   : > { %p1504_p6 = pnand %p1503_p11, %p1497_p8 }
 0x1e7   : > { %1507 = shalt.err (!%p1504_p6)  }
 0x1e8   : > { %988 = dma.hbm_to_vmem [thread:$0]  (%p2121_p12), %s502_s16, 16, %s513_s14, %s2178_s4 }
 0x1e9   : > { %s519_s7 = scalar_select %p518_p10, %s2323_s11, 63 }
 0x1ea   : > { %p887_p1 = scmp.gt.s32.totalorder %s2323_s11, 0  ;;  %s533_s30 = sshll.u32 %s727_s5, 4  ;;  %s534_s30 = int_to_ptr.vmem [resolvable:$true] %s533_s30 }
 0x1eb   : > { %s2617_s8 = smov (!%p2121_p12, %s537_s8), 0 }
 0x1ec   : > { %s2619_s7 = smov (!%p887_p1, %s519_s7), 0  ;;  %s538_s29 = sld [smem:[%s992_s15 + %s2617_s8]] }
 0x1ed   : > { %s892_s20 = sshll.u32 %s2619_s7, 4 }
 0x1ee   : > { %s523_s23 = scalar_lea.hbm %s2461_s1, %s892_s20 }
 0x1ef   : > { %s1508_s3 = scalar_lea.hbm %s523_s23, 16  ;;  %p1513_p10 = scmp.lt.s32.totalorder %s523_s23, %s2461_s1 }
 0x1f0   : > { %p1509_p7 = scmp.ne.s32.totalorder %s523_s23, %s1508_s3  ;;  %p1514_p3 = scmp.lt.s32.totalorder %s1901_s28, %s1508_s3 }
 0x1f2   : > { %p1510_p9 = pnand %p1509_p7, %p2121_p12  ;;  %p1515_p5 = por %p1514_p3, %p1513_p10 }
 0x1f4   : > { %p1511_p0 = pneg %p1510_p9 }
 0x1f6   : > { %p1516_p13 = pnand %p1515_p5, %p1511_p0 }
 0x1f8   : > { %1519 = shalt.err (!%p1516_p13)  }
 0x1f9   : > { %s1520_s5 = scalar_lea.vmem %s534_s30, 16  ;;  %p1527_p11 = scmp.lt.s32.totalorder %s534_s30, %s1878_s9 }
 0x1fa   : > { %p1521_p8 = scmp.ne.s32.totalorder %s534_s30, %s1520_s5  ;;  %p1528_p6 = scmp.lt.s32.totalorder %s1912_s25, %s1520_s5 }
 0x1fc   : > { %p1522_p2 = pnand %p1521_p8, %p2121_p12  ;;  %p1529_p1 = por %p1528_p6, %p1527_p11 }
 0x1fe   : > { %p1523_p4 = pneg %p1522_p2 }
 0x200   : > { %p1530_p7 = pnand %p1529_p1, %p1523_p4 }
 0x202   : > { %1533 = shalt.err (!%p1530_p7)  }
 0x203   : > { %991 = dma.hbm_to_vmem [thread:$0]  (%p2121_p12), %s523_s23, 16, %s534_s30, %s2178_s4 }
 0x204   : > { %s732_s15 = scalar_lea.vmem %s2155_s12, 7 [#allocation2]  ;;  %p539_p9 = scmp.lt.s32.totalorder %s538_s29, 63 }
 0x205   : > { %p894_p0 = scmp.gt.s32.totalorder %s538_s29, 0  ;;  %s554_s8 = sshll.u32 %s732_s15, 4  ;;  %s555_s8 = int_to_ptr.vmem [resolvable:$true] %s554_s8 }
 0x206   : > { %s2621_s29 = smov (!%p539_p9, %s538_s29), 63 }
 0x207   : > { %s2623_s29 = smov (!%p894_p0, %s2621_s29), 0 }
 0x208   : > { %s899_s16 = sshll.u32 %s2623_s29, 4 }
 0x209   : > { %s544_s26 = scalar_lea.hbm %s2461_s1, %s899_s16 }
 0x20a   : > { %s1534_s7 = scalar_lea.hbm %s544_s26, 16  ;;  %p1539_p13 = scmp.lt.s32.totalorder %s544_s26, %s2461_s1 }
 0x20b   : > { %p1535_p10 = scmp.ne.s32.totalorder %s544_s26, %s1534_s7  ;;  %p1540_p8 = scmp.lt.s32.totalorder %s1901_s28, %s1534_s7 }
 0x20d   : > { %p1536_p3 = pnand %p1535_p10, %p2121_p12  ;;  %p1541_p2 = por %p1540_p8, %p1539_p13 }
 0x20f   : > { %p1537_p5 = pneg %p1536_p3 }
 0x211   : > { %p1542_p4 = pnand %p1541_p2, %p1537_p5 }
 0x213   : > { %1545 = shalt.err (!%p1542_p4)  }
 0x214   : > { %s1546_s12 = scalar_lea.vmem %s555_s8, 16  ;;  %p1553_p7 = scmp.lt.s32.totalorder %s555_s8, %s1878_s9 }
 0x215   : > { %p1547_p11 = scmp.ne.s32.totalorder %s555_s8, %s1546_s12  ;;  %p1554_p9 = scmp.lt.s32.totalorder %s1912_s25, %s1546_s12 }
 0x217   : > { %p1548_p6 = pnand %p1547_p11, %p2121_p12  ;;  %p1555_p0 = por %p1554_p9, %p1553_p7 }
 0x219   : > { %p1549_p1 = pneg %p1548_p6 }
 0x21b   : > { %p1556_p10 = pnand %p1555_p0, %p1549_p1 }
 0x21d   : > { %1559 = shalt.err (!%p1556_p10)  }
 0x21e   : > { %994 = dma.hbm_to_vmem [thread:$0]  (%p2121_p12), %s544_s26, 16, %s555_s8, %s2178_s4 }
 0x21f   : > { %s205_s28 = scalar_lea.vmem [#allocation9], %s1862_s6  ;;  %s558_s30 = scalar_lea.sflag [#allocation3], %s2579_s18 }
 0x220   : > { %1636 = dma.done.wait %s558_s30, 128 }
 0x221   : > { %1637 = vsyncadd %s558_s30, 4294967168  ;;  %s901_s29 = sshll.u32 %s2579_s18, 3  ;;  %s2512_s25 = scalar_lea.vmem [#allocation6], %s1851_s24 }
 0x222   : > { %s577_s9 = scalar_lea.vmem [#allocation2], %s901_s29  ;;  %v579_v1 = vld [vmem:[%s2512_s25] sm:$0xff]  ;;  %s905_s4 = sshll.u32 %s1672_s27, 1 }
 0x223   : > { %v578_v0 = vld [vmem:[%s577_s9] sm:$0xff]  ;;  %s622_s2 = sadd.s32 %s1668_s0, %s905_s4  ;;  %s2513_s13 = sld [smem:[#allocation77_spill]] }
 0x224   : > { %v580_v2 = vadd.f32 %v579_v1, %v578_v0  ;;  %s2514_s14 = sld [smem:[#allocation78_spill]]  ;;  %s906_s11 = sshll.u32 %s622_s2, 7 }
 0x225   : > { %s626_s5 = sshll.u32 %s205_s28, 4  ;;  %s2515_s27 = sld [smem:[#allocation79_spill]]  ;;  %s627_s5 = int_to_ptr.vmem [resolvable:$true] %s626_s5 }
 0x226   : > { %581 = vadd.xlane.f32.xlu0 %v580_v2  ;;  %s2517_s0 = sand.u32 1, %s1648_s22   ;;  %s1560_s26 = scalar_lea.vmem %s627_s5, 128 }
 0x227   : > { %s611_s17 = scalar_lea.sflag [#allocation8], %s2517_s0  ;;  %p1561_p12 = scmp.ne.s32.totalorder %s627_s5, %s1560_s26 }
 0x228   : > { %p2518_p3 = scmp.ne.s32.totalorder %s2497_s19, 0  ;;  %s1696_s7 = smov [#allocation9]  }
 0x229   : > { %v902_v11 = vld [vmem:[%s2513_s13] ss:$0 sm:$0xff]  ;;  %s1564_s20 = sshll.u32 %s1696_s7, 4  ;;  %s1565_s20 = int_to_ptr.vmem [resolvable:$false] %s1564_s20 }
 0x22a   : > { %v903_v13 = vld [vmem:[%s2514_s14] ss:$0 sm:$0xff]  ;;  %p1562_p5 = pnand %p1561_p12, %p2518_p3  ;;  %s1566_s10 = scalar_lea.vmem %s1565_s20, 256 }
 0x22b   : > { %s2516_s16 = smov %s2515_s27  ;;  %s624_s21 = scalar_lea.hbm %s2515_s27, %s906_s11 }
 0x22c   : > { %p1563_p13 = pneg %p1562_p5  ;;  %p1567_p8 = scmp.lt.s32.totalorder %s627_s5, %s1565_s20 }
 0x22d   : > { %p1568_p2 = scmp.lt.s32.totalorder %s1566_s10, %s1560_s26 }
 0x22f   : > { %p1569_p4 = por %p1568_p2, %p1567_p8 }
 0x231   : > { %p1570_p11 = pnand %p1569_p4, %p1563_p13 }
 0x2af   : > { %v582_v3 = vpop.xlane.xlu0 %581 }
 0x2b0   : > { %v584_v4 = vmul.f32 0.0078125, %v582_v3 }
 0x2b2   : > { %v585_v5 = vsub.f32 %v580_v2, %v584_v4 }
 0x2b4   : > { %v586_v6 = vmul.f32 %v585_v5, %v585_v5 }
 0x2b6   : > { %587 = vadd.xlane.f32.xlu0 %v586_v6 }
 0x33f   : > { %v588_v7 = vpop.xlane.xlu0 %587 }
 0x340   : > { %v589_v8 = vmul.f32 0.0078125, %v588_v7 }
 0x342   : > { %v590_v9 = vadd.f32 1e-08, %v589_v8 }
 0x344   : > { %1106 = vrsqrt.f32 %v590_v9 }
 0x351   : > { %v1107_v10 = vpop.eup %1106 }
 0x352   : > { %v592_v12 = vmul.f32 %v1107_v10, %v585_v5 }
 0x354   : > { %v600_v14 = vmul.f32 %v902_v11, %v592_v12 }
 0x356   : > { %v608_v15 = vadd.f32 %v903_v13, %v600_v14 }
 0x358   : > { %609 = vst [vmem:[%s205_s28] sm:$0xff] %v608_v15 }
 0x359   : > { %1573 = shalt.err (!%p1570_p11)
}
 0x35a   : > { %s1574_s12 = scalar_lea.hbm %s624_s21, 128  ;;  %s1578_s30 = scalar_lea.hbm %s2516_s16, 512 }
 0x35b   : > { %p1575_p6 = scmp.ne.s32.totalorder %s624_s21, %s1574_s12  ;;  %p1579_p9 = scmp.lt.s32.totalorder %s624_s21, %s2516_s16 }
 0x35c   : > { %p1580_p0 = scmp.lt.s32.totalorder %s1578_s30, %s1574_s12 }
 0x35d   : > { %p1576_p1 = pnand %p1575_p6, %p2518_p3 }
 0x35e   : > { %p1581_p10 = por %p1580_p0, %p1579_p9 }
 0x35f   : > { %p1577_p7 = pneg %p1576_p1 }
 0x361   : > { %p1582_p12 = pnand %p1581_p10, %p1577_p7 }
 0x363   : > { %1585 = shalt.err (!%p1582_p12)
}
 0x364   : > { %995 = dma.vmem_to_hbm [thread:$0]  (%p2518_p3), %s627_s5, 128, %s624_s21, %s611_s17  }
 0x365 PF: > { %s2519_s25 = sld [smem:[#allocation70_spill]] }
 0x366   : > { %s2520_s4 = sld [smem:[#allocation64_spill]] }
 0x367   : > { %s2521_s2 = sld [smem:[#allocation75_spill]] }
 0x36b   : > { %p1008_p5 = scmp.ge.s32.totalorder %s2519_s25, 2 }
 0x36c   : > { %s638_s24 = sand.u32 1, %s2520_s4  }
 0x36d   : > { %p2522_p13 = scmp.ne.s32.totalorder %s2521_s2, 0  ;;  %s639_s18 = scalar_lea.sflag [#allocation8], %s638_s24 }
 0x36f   : > { %p1002_p8 = pnand %p1008_p5, %p2522_p13 }
 0x371   : > { %p1003_p2 = pneg %p1002_p8 }
 0x373   : > { %1639 = dma.done.wait (%p1003_p2), %s639_s18, 128  }
 0x374   : > { %1641 = vsyncadd (%p1003_p2), %s639_s18, 4294967168  ;;  %s25_s30 = sadd.s32 1, %s2519_s25   ;;  %s2523_s13 = sld [smem:[#allocation65_spill]] }
 0x375   : > { %p22_p4 = scmp.ge.s32.totalorder %s25_s30, 6   ;;  %s2524_s23 = sld [smem:[#allocation74_spill]] }
 0x376   : > { %s2525_s24 = sld [smem:[#allocation66_spill]]  ;;  %s2532_s21 = smov %s1648_s22 }
 0x377   : > { %s2526_s25 = sld [smem:[#allocation67_spill]] }
 0x378   : > { %s2527_s26 = sld [smem:[#allocation73_spill]]  ;;  %24 = sbr.rel (!%p22_p4) target bundleno = 18 (0x12), region = 184 }
 0x379   : > { %s2528_s0 = sld [smem:[#allocation68_spill]] }
 0x37a   : > { %s2529_s27 = sld [smem:[#allocation69_spill]]  ;;  %s2533_s22 = smov %s2523_s13 }
 0x37b   : > { %s2530_s28 = sld [smem:[#allocation71_spill]] }
 0x37c   : > { %s2531_s29 = sld [smem:[#allocation72_spill]] }
 0x37d   :  { %644 = vsyncpa [#allocation7], 1 }
 0x37e   :  { %646 = vsyncpa [#allocation7 + $0x1], 1 }
 0x37f   :  { %647 = vsyncpa [#allocation8], 1 }
 0x380   :  { %649 = vsyncpa [#allocation8 + $0x1], 1 }
 0x381   :  { %650 = vsyncmov [#allocation3] }
 0x384   :  { %s651_s19 = vpop.sfrf %650 }
 0x385   :  { %p909_p3 = scmp.ne.s32.totalorder %s651_s19, 0 }
 0x387   :  { %655 = shalt.err (%p909_p3)  }
 0x388   :  { %657 = vsyncmov [#allocation3 + $0x1] }
 0x38b   :  { %s658_s3 = vpop.sfrf %657 }
 0x38c   :  { %p910_p11 = scmp.ne.s32.totalorder %s658_s3, 0 }
 0x38e   :  { %662 = shalt.err (%p910_p11)  }

</bundles_post_ra>
